<compile_context>
chip_gen: v6e
topology: v6e:2x2x1
jax: 0.10.0
libtpu: 0.0.40
codegen_flags: <defaults>
</compile_context>

<pallas_src>
import functools

import jax
import jax.numpy as jnp
from jax.experimental import pallas as pl
from jax.experimental.pallas import tpu as pltpu

# ----------------- small synthetic config (consistent with the module) -------
VOCAB = 100
MAX_SEQ = 64
PAD_ID = 0
DIM = 32
DEPTH = 2
HEADS = 2
DIM_HEAD = 16
INNER = HEADS * DIM_HEAD                  # 32
FF_MULT = 3
FF_HIDDEN = int(DIM * FF_MULT * 2 / 3)    # 64 -> GEGLU input width 128 (lane dense)
ATTN_SCALE = 8.0                          # Attention(scale=8) fixed scale
BATCH = 2
TOKENS = 7                                # +1 CLS token -> S = 8 (sublane aligned)
SEQ = TOKENS + 1


def _layer_norm(x, gamma, eps=1e-5):
    mu = jnp.mean(x, axis=-1, keepdims=True)
    var = jnp.mean(jnp.square(x - mu), axis=-1, keepdims=True)
    return (x - mu) * jax.lax.rsqrt(var + eps) * gamma        # beta buffer == 0


def _l2norm(x, eps=1e-12):
    return x * jax.lax.rsqrt(jnp.sum(x * x, axis=-1, keepdims=True) + eps)


# ------------------------------ fused kernel ---------------------------------
def transformer_kernel(x_ref, bias_ref, g_attn_ref, wqkv_ref, qk_ref, wo_ref,
                       g_ff_ref, wf1_ref, wf2_ref, g_out_ref, out_ref,
                       *, depth, batch, seq, num_heads, dim_head):
    """Whole transformer forward in one invocation; layers statically unrolled."""
    dim = x_ref.shape[-1]
    inner = num_heads * dim_head
    bs = batch * seq

    x = x_ref[...]                                   # (B*S, D) f32 residual stream
    bias = bias_ref[...]                             # (H*B, 1, S) f32: 0 / -1e30

    def split_heads(t):                              # (B*S, inner) -> (H*B, S, dh)
        return jnp.concatenate(
            [t[:, h * dim_head:(h + 1) * dim_head].reshape(batch, seq, dim_head)
             for h in range(num_heads)], axis=0)     # head-major merged batch

    for layer in range(depth):                       # static unroll, weights resident
        # ---------------- attention block (pre-LN, residual) -----------------
        h = _layer_norm(x, g_attn_ref[layer])
        h16 = h.astype(jnp.bfloat16)
        qkv = jnp.dot(h16, wqkv_ref[layer],
                      preferred_element_type=jnp.float32)     # (B*S, 3*inner)
        q = qkv[:, :inner]
        k = qkv[:, inner:2 * inner]
        v = qkv[:, 2 * inner:]

        scales = qk_ref[layer]                       # (2, dh); row 0 has attn_scale folded in
        qh = _l2norm(split_heads(q)) * scales[0:1, :]          # (H*B, S, dh)
        kh = _l2norm(split_heads(k)) * scales[1:2, :]
        vh = split_heads(v)

        sim = jnp.einsum('gid,gjd->gij', qh, kh,
                         preferred_element_type=jnp.float32) + bias   # (H*B, S, S)
        sim = sim - jnp.max(sim, axis=-1, keepdims=True)
        p = jnp.exp(sim)
        p = p * pl.reciprocal(jnp.sum(p, axis=-1, keepdims=True), approx=True)
        ctx = jnp.einsum('gij,gjd->gid', p, vh,
                         preferred_element_type=jnp.float32)          # (H*B, S, dh)
        ctx2 = jnp.concatenate(
            [ctx[h * batch:(h + 1) * batch].reshape(bs, dim_head)
             for h in range(num_heads)], axis=-1)                     # (B*S, inner)
        x = x + jnp.dot(ctx2.astype(jnp.bfloat16), wo_ref[layer],
                        preferred_element_type=jnp.float32)

        # ---------------- feed-forward block (pre-LN, GEGLU, residual) -------
        h = _layer_norm(x, g_ff_ref[layer])
        u = jnp.dot(h.astype(jnp.bfloat16), wf1_ref[layer],
                    preferred_element_type=jnp.float32)               # (B*S, 2*ff)
        ff = u.shape[-1] // 2
        # Lane-dense GEGLU: roll gate under val (XLU slot), gelu * u on the full
        # 128-wide tensor; the upper-half garbage is zeroed by the padded W_ff2.
        # TODO(synk): PyTorch F.gelu defaults to exact erf; tanh approximation here.
        act = jax.nn.gelu(pltpu.roll(u, shift=ff, axis=1), approximate=True) * u
        x = x + jnp.dot(act.astype(jnp.bfloat16), wf2_ref[layer],
                        preferred_element_type=jnp.float32)

    # ---------------- fused "pooling": CLS row + final LayerNorm -------------
    cls = x.reshape(batch, seq, dim)[:, 0, :]                         # (B, D)
    out_ref[...] = _layer_norm(cls, g_out_ref[...]).astype(out_ref.dtype)


# ------------------------------ wrapper ---------------------------------------
def run_transformer(x_flat, bias_g, g_attn, wqkv, qk, wo, g_ff, wf1, wf2p, g_final):
    bs, dim = x_flat.shape
    s = bias_g.shape[-1]
    b = bs // s
    depth, _, qkv_w = wqkv.shape
    inner = qkv_w // 3
    dim_head = qk.shape[-1]
    num_heads = inner // dim_head
    ff2 = wf1.shape[-1]                              # 2 * ff_hidden

    flops = depth * (2 * bs * dim * qkv_w                      # fused QKV
                     + 2 * (num_heads * b) * s * s * dim_head * 2  # scores + ctx
                     + 2 * bs * inner * dim                    # W_o
                     + 2 * bs * dim * ff2                      # W_ff1
                     + 2 * bs * ff2 * dim)                     # W_ff2 (padded K)
    transcendentals = depth * (num_heads * b * s * s + bs * ff2)   # exp + gelu
    args = (x_flat, bias_g, g_attn, wqkv, qk, wo, g_ff, wf1, wf2p, g_final)
    bytes_accessed = sum(int(a.size) * a.dtype.itemsize for a in args) + b * dim * 4

    kernel = functools.partial(
        transformer_kernel, depth=depth, batch=b, seq=s,
        num_heads=num_heads, dim_head=dim_head)

    # No grid: whole arrays land in VMEM once (<100 KB total, fine on v5e/v6e/v7x).
    return pl.pallas_call(
        kernel,
        out_shape=jax.ShapeDtypeStruct((b, dim), jnp.float32),
        cost_estimate=pl.CostEstimate(flops=int(flops),
                                      transcendentals=int(transcendentals),
                                      bytes_accessed=int(bytes_accessed)),
    )(*args)


def text_transformer_forward(token_ids, params):
    """TextTransformer.forward on already-tokenized input_ids -> (B, dim)."""
    b, n = token_ids.shape
    assert n + 1 <= MAX_SEQ
    mask = token_ids != PAD_ID                                       # (B, n)
    x = jnp.take(params['tok_emb'], token_ids, axis=0) + params['pos_emb'][None, :n, :]
    cls = jnp.broadcast_to(params['cls_token'][None, None, :], (b, 1, DIM))
    x = jnp.concatenate([cls, x], axis=1)                            # (B, S, D)
    mask = jnp.concatenate([jnp.ones((b, 1), dtype=bool), mask], axis=1)
    bias = jnp.where(mask, 0.0, -1e30).astype(jnp.float32)[:, None, :]   # (B, 1, S)
    bias_g = jnp.tile(bias, (HEADS, 1, 1))                           # (H*B, 1, S), head-major
    s = n + 1
    x_flat = x.reshape(b * s, DIM).astype(jnp.float32)

    # ---- kernel-side weight prep (pure layout / folding, no math change) ----
    wqkv = jnp.concatenate([params['wq'], params['wkv']], axis=-1)   # (L, D, 3*inner)
    qk_eff = params['qk_scale'] * jnp.array([[ATTN_SCALE], [1.0]], jnp.float32)
    wf2p = jnp.concatenate([params['wf2'], jnp.zeros_like(params['wf2'])], axis=1)

    return run_transformer(x_flat, bias_g, params['g_attn'], wqkv, qk_eff,
                           params['wo'], params['g_ff'], params['wf1'], wf2p,
                           params['g_final'])


# ------------------------------ params / reference ----------------------------
def init_params(key):
    ks = jax.random.split(key, 8)

    def w(k, shape):
        return (0.02 * jax.random.normal(k, shape, jnp.float32)).astype(jnp.bfloat16)

    return {
        'tok_emb': jax.random.normal(ks[0], (VOCAB, DIM), jnp.float32),
        'pos_emb': jax.random.normal(ks[1], (MAX_SEQ, DIM), jnp.float32),
        'cls_token': jax.random.normal(ks[2], (DIM,), jnp.float32),
        'g_attn': jnp.ones((DEPTH, 1, DIM), jnp.float32),
        'wq': w(ks[3], (DEPTH, DIM, INNER)),
        'wkv': w(ks[4], (DEPTH, DIM, 2 * INNER)),
        'qk_scale': jnp.ones((DEPTH, 2, DIM_HEAD), jnp.float32),
        'wo': w(ks[5], (DEPTH, INNER, DIM)),
        'g_ff': jnp.ones((DEPTH, 1, DIM), jnp.float32),
        'wf1': w(ks[6], (DEPTH, DIM, 2 * FF_HIDDEN)),
        'wf2': w(ks[7], (DEPTH, FF_HIDDEN, DIM)),
        'g_final': jnp.ones((1, DIM), jnp.float32),
    }


def reference_forward(token_ids, params):
    """Pure-JAX reference with the same bf16-matmul / f32-accumulate policy."""
    b, n = token_ids.shape
    mask = token_ids != PAD_ID
    x = jnp.take(params['tok_emb'], token_ids, axis=0) + params['pos_emb'][None, :n, :]
    cls = jnp.broadcast_to(params['cls_token'][None, None, :], (b, 1, DIM))
    x = jnp.concatenate([cls, x], axis=1)
    mask = jnp.concatenate([jnp.ones((b, 1), dtype=bool), mask], axis=1)
    bias = jnp.where(mask, 0.0, -1e30)[:, None, None, :]             # (B,1,1,S)
    dot = functools.partial(jnp.einsum, preferred_element_type=jnp.float32)
    for l in range(DEPTH):
        h = _layer_norm(x, params['g_attn'][l]).astype(jnp.bfloat16)
        q = dot('bsd,df->bsf', h, params['wq'][l])
        kvp = dot('bsd,df->bsf', h, params['wkv'][l])
        k, v = kvp[..., :INNER], kvp[..., INNER:]
        split = lambda t: t.reshape(b, -1, HEADS, DIM_HEAD).transpose(0, 2, 1, 3)
        qh = _l2norm(split(q)) * params['qk_scale'][l, 0]
        kh = _l2norm(split(k)) * params['qk_scale'][l, 1]
        vh = split(v)
        sim = dot('bhid,bhjd->bhij', qh, kh) * ATTN_SCALE + bias
        attn = jax.nn.softmax(sim, axis=-1)
        ctx = dot('bhij,bhjd->bhid', attn, vh)
        ctx = ctx.transpose(0, 2, 1, 3).reshape(b, -1, INNER)
        x = x + dot('bsf,fd->bsd', ctx.astype(jnp.bfloat16), params['wo'][l])
        h = _layer_norm(x, params['g_ff'][l]).astype(jnp.bfloat16)
        u = dot('bsd,df->bsf', h, params['wf1'][l])
        val, gate = u[..., :FF_HIDDEN], u[..., FF_HIDDEN:]
        act = jax.nn.gelu(gate, approximate=True) * val
        x = x + dot('bsf,fd->bsd', act.astype(jnp.bfloat16), params['wf2'][l])
    return _layer_norm(x[:, 0, :], params['g_final'])


if __name__ == "__main__":
    key = jax.random.PRNGKey(0)
    pkey, dkey = jax.random.split(key)
    params = init_params(pkey)

    token_ids = jax.random.randint(dkey, (BATCH, TOKENS), 1, VOCAB, dtype=jnp.int32)
    token_ids = token_ids.at[:, -2:].set(PAD_ID)      # trailing padding -> masked keys

    out = text_transformer_forward(token_ids, params)
    jax.block_until_ready(out)

    assert out.shape == (BATCH, DIM) and out.dtype == jnp.float32
    assert bool(jnp.all(jnp.isfinite(out)))

    ref = reference_forward(token_ids, params)
    assert bool(jnp.allclose(out, ref, atol=5e-2, rtol=5e-2)), (
        f"max abs err {float(jnp.max(jnp.abs(out - ref)))}")

    print("KERNEL_OK")
</pallas_src>

<mosaic_0001>
module attributes {stable_mosaic.version = 11 : i64} {
  func.func @transformer_kernel(%arg0: memref<16x32xf32, #tpu.memory_space<vmem>>, %arg1: memref<4x1x8xf32, #tpu.memory_space<vmem>>, %arg2: memref<2x1x32xf32, #tpu.memory_space<vmem>>, %arg3: memref<2x32x96xbf16, #tpu.memory_space<vmem>>, %arg4: memref<2x2x16xf32, #tpu.memory_space<vmem>>, %arg5: memref<2x32x32xbf16, #tpu.memory_space<vmem>>, %arg6: memref<2x1x32xf32, #tpu.memory_space<vmem>>, %arg7: memref<2x32x128xbf16, #tpu.memory_space<vmem>>, %arg8: memref<2x128x32xbf16, #tpu.memory_space<vmem>>, %arg9: memref<1x32xf32, #tpu.memory_space<vmem>>, %arg10: memref<2x32xf32, #tpu.memory_space<vmem>>) attributes {dimension_semantics = [], scalar_prefetch = 0 : i64, scratch_operands = 0 : i64, tpu.core_type = #tpu.core_type<tc>} {
    %c0 = arith.constant 0 : index
    %c0_0 = arith.constant 0 : index
    %0 = vector.load %arg0[%c0, %c0_0] : memref<16x32xf32, #tpu.memory_space<vmem>>, vector<16x32xf32>
    %c0_1 = arith.constant 0 : index
    %c0_2 = arith.constant 0 : index
    %c0_3 = arith.constant 0 : index
    %1 = vector.load %arg1[%c0_1, %c0_2, %c0_3] : memref<4x1x8xf32, #tpu.memory_space<vmem>>, vector<4x1x8xf32>
    %c0_4 = arith.constant 0 : index
    %c0_5 = arith.constant 0 : index
    %c0_6 = arith.constant 0 : index
    %2 = vector.load %arg2[%c0_4, %c0_5, %c0_6] : memref<2x1x32xf32, #tpu.memory_space<vmem>>, vector<1x1x32xf32>
    %3 = vector.shape_cast %2 : vector<1x1x32xf32> to vector<1x32xf32>
    %cst = arith.constant dense<0.000000e+00> : vector<16xf32>
    %4 = vector.multi_reduction <add>, %0, %cst [1] : vector<16x32xf32> to vector<16xf32>
    %5 = vector.shape_cast %4 : vector<16xf32> to vector<16x1xf32>
    %cst_7 = arith.constant 3.200000e+01 : f32
    %6 = vector.broadcast %cst_7 : f32 to vector<16x1xf32>
    %7 = arith.divf %5, %6 : vector<16x1xf32>
    %8 = vector.broadcast %7 : vector<16x1xf32> to vector<16x32xf32>
    %9 = arith.subf %0, %8 : vector<16x32xf32>
    %10 = arith.mulf %9, %9 : vector<16x32xf32>
    %cst_8 = arith.constant dense<0.000000e+00> : vector<16xf32>
    %11 = vector.multi_reduction <add>, %10, %cst_8 [1] : vector<16x32xf32> to vector<16xf32>
    %12 = vector.shape_cast %11 : vector<16xf32> to vector<16x1xf32>
    %cst_9 = arith.constant 3.200000e+01 : f32
    %13 = vector.broadcast %cst_9 : f32 to vector<16x1xf32>
    %14 = arith.divf %12, %13 : vector<16x1xf32>
    %15 = vector.broadcast %7 : vector<16x1xf32> to vector<16x32xf32>
    %16 = arith.subf %0, %15 : vector<16x32xf32>
    %cst_10 = arith.constant 9.99999974E-6 : f32
    %17 = vector.broadcast %cst_10 : f32 to vector<16x1xf32>
    %18 = arith.addf %14, %17 : vector<16x1xf32>
    %19 = math.rsqrt %18 : vector<16x1xf32>
    %20 = vector.broadcast %19 : vector<16x1xf32> to vector<16x32xf32>
    %21 = arith.mulf %16, %20 : vector<16x32xf32>
    %22 = vector.broadcast %3 : vector<1x32xf32> to vector<16x32xf32>
    %23 = arith.mulf %21, %22 : vector<16x32xf32>
    %24 = arith.truncf %23 : vector<16x32xf32> to vector<16x32xbf16>
    %c0_11 = arith.constant 0 : index
    %c0_12 = arith.constant 0 : index
    %c0_13 = arith.constant 0 : index
    %25 = vector.load %arg3[%c0_11, %c0_12, %c0_13] : memref<2x32x96xbf16, #tpu.memory_space<vmem>>, vector<1x32x96xbf16>
    %26 = vector.shape_cast %25 : vector<1x32x96xbf16> to vector<32x96xbf16>
    %cst_14 = arith.constant dense<0.000000e+00> : vector<16x96xf32>
    %27 = tpu.matmul %24, %26, %cst_14 {dimension_numbers = #tpu.dot_dimension_numbers<[1], [0], [0], [1], [0, 0, 1, 1], [], []>} : vector<16x32xbf16>, vector<32x96xbf16>, vector<16x96xf32> -> vector<16x96xf32>
    %28 = vector.extract_strided_slice %27 {offsets = [0, 0], sizes = [16, 32], strides = [1, 1]} : vector<16x96xf32> to vector<16x32xf32>
    %29 = vector.extract_strided_slice %27 {offsets = [0, 32], sizes = [16, 32], strides = [1, 1]} : vector<16x96xf32> to vector<16x32xf32>
    %30 = vector.extract_strided_slice %27 {offsets = [0, 64], sizes = [16, 32], strides = [1, 1]} : vector<16x96xf32> to vector<16x32xf32>
    %c0_15 = arith.constant 0 : index
    %c0_16 = arith.constant 0 : index
    %c0_17 = arith.constant 0 : index
    %31 = vector.load %arg4[%c0_15, %c0_16, %c0_17] : memref<2x2x16xf32, #tpu.memory_space<vmem>>, vector<1x2x16xf32>
    %32 = vector.shape_cast %31 : vector<1x2x16xf32> to vector<2x16xf32>
    %33 = vector.extract_strided_slice %28 {offsets = [0, 0], sizes = [16, 16], strides = [1, 1]} : vector<16x32xf32> to vector<16x16xf32>
    %34 = vector.shape_cast %33 : vector<16x16xf32> to vector<2x8x16xf32>
    %35 = vector.extract_strided_slice %28 {offsets = [0, 16], sizes = [16, 16], strides = [1, 1]} : vector<16x32xf32> to vector<16x16xf32>
    %36 = vector.shape_cast %35 : vector<16x16xf32> to vector<2x8x16xf32>
    %37 = tpu.concatenate %34, %36 in 0 : vector<2x8x16xf32>, vector<2x8x16xf32> -> vector<4x8x16xf32>
    %38 = arith.mulf %37, %37 : vector<4x8x16xf32>
    %cst_18 = arith.constant dense<0.000000e+00> : vector<4x8xf32>
    %39 = vector.multi_reduction <add>, %38, %cst_18 [2] : vector<4x8x16xf32> to vector<4x8xf32>
    %40 = vector.shape_cast %39 : vector<4x8xf32> to vector<4x8x1xf32>
    %cst_19 = arith.constant 9.99999996E-13 : f32
    %41 = vector.broadcast %cst_19 : f32 to vector<4x8x1xf32>
    %42 = arith.addf %40, %41 : vector<4x8x1xf32>
    %43 = math.rsqrt %42 : vector<4x8x1xf32>
    %44 = vector.broadcast %43 : vector<4x8x1xf32> to vector<4x8x16xf32>
    %45 = arith.mulf %37, %44 : vector<4x8x16xf32>
    %46 = vector.extract_strided_slice %32 {offsets = [0, 0], sizes = [1, 16], strides = [1, 1]} : vector<2x16xf32> to vector<1x16xf32>
    %47 = vector.shape_cast %46 : vector<1x16xf32> to vector<1x1x16xf32>
    %48 = vector.broadcast %47 : vector<1x1x16xf32> to vector<4x8x16xf32>
    %49 = arith.mulf %45, %48 : vector<4x8x16xf32>
    %50 = vector.extract_strided_slice %29 {offsets = [0, 0], sizes = [16, 16], strides = [1, 1]} : vector<16x32xf32> to vector<16x16xf32>
    %51 = vector.shape_cast %50 : vector<16x16xf32> to vector<2x8x16xf32>
    %52 = vector.extract_strided_slice %29 {offsets = [0, 16], sizes = [16, 16], strides = [1, 1]} : vector<16x32xf32> to vector<16x16xf32>
    %53 = vector.shape_cast %52 : vector<16x16xf32> to vector<2x8x16xf32>
    %54 = tpu.concatenate %51, %53 in 0 : vector<2x8x16xf32>, vector<2x8x16xf32> -> vector<4x8x16xf32>
    %55 = arith.mulf %54, %54 : vector<4x8x16xf32>
    %cst_20 = arith.constant dense<0.000000e+00> : vector<4x8xf32>
    %56 = vector.multi_reduction <add>, %55, %cst_20 [2] : vector<4x8x16xf32> to vector<4x8xf32>
    %57 = vector.shape_cast %56 : vector<4x8xf32> to vector<4x8x1xf32>
    %cst_21 = arith.constant 9.99999996E-13 : f32
    %58 = vector.broadcast %cst_21 : f32 to vector<4x8x1xf32>
    %59 = arith.addf %57, %58 : vector<4x8x1xf32>
    %60 = math.rsqrt %59 : vector<4x8x1xf32>
    %61 = vector.broadcast %60 : vector<4x8x1xf32> to vector<4x8x16xf32>
    %62 = arith.mulf %54, %61 : vector<4x8x16xf32>
    %63 = vector.extract_strided_slice %32 {offsets = [1, 0], sizes = [1, 16], strides = [1, 1]} : vector<2x16xf32> to vector<1x16xf32>
    %64 = vector.shape_cast %63 : vector<1x16xf32> to vector<1x1x16xf32>
    %65 = vector.broadcast %64 : vector<1x1x16xf32> to vector<4x8x16xf32>
    %66 = arith.mulf %62, %65 : vector<4x8x16xf32>
    %67 = vector.extract_strided_slice %30 {offsets = [0, 0], sizes = [16, 16], strides = [1, 1]} : vector<16x32xf32> to vector<16x16xf32>
    %68 = vector.shape_cast %67 : vector<16x16xf32> to vector<2x8x16xf32>
    %69 = vector.extract_strided_slice %30 {offsets = [0, 16], sizes = [16, 16], strides = [1, 1]} : vector<16x32xf32> to vector<16x16xf32>
    %70 = vector.shape_cast %69 : vector<16x16xf32> to vector<2x8x16xf32>
    %71 = tpu.concatenate %68, %70 in 0 : vector<2x8x16xf32>, vector<2x8x16xf32> -> vector<4x8x16xf32>
    "tpu.trace_start"() <{level = 10 : i32, message = "gid,gjd->gij"}> : () -> ()
    %cst_22 = arith.constant dense<0.000000e+00> : vector<4x8x8xf32>
    %72 = tpu.matmul %49, %66, %cst_22 {dimension_numbers = #tpu.dot_dimension_numbers<[2], [2], [1], [1], [0, 0, 0, 1, 1, 1], [0], [0]>} : vector<4x8x16xf32>, vector<4x8x16xf32>, vector<4x8x8xf32> -> vector<4x8x8xf32>
    "tpu.trace_stop"() : () -> ()
    %73 = vector.broadcast %1 : vector<4x1x8xf32> to vector<4x8x8xf32>
    %74 = arith.addf %72, %73 : vector<4x8x8xf32>
    %cst_23 = arith.constant dense<0xFF800000> : vector<4x8xf32>
    %75 = vector.multi_reduction <maximumf>, %74, %cst_23 [2] : vector<4x8x8xf32> to vector<4x8xf32>
    %76 = vector.shape_cast %75 : vector<4x8xf32> to vector<4x8x1xf32>
    %77 = vector.broadcast %76 : vector<4x8x1xf32> to vector<4x8x8xf32>
    %78 = arith.subf %74, %77 : vector<4x8x8xf32>
    %79 = math.exp %78 : vector<4x8x8xf32>
    %cst_24 = arith.constant dense<0.000000e+00> : vector<4x8xf32>
    %80 = vector.multi_reduction <add>, %79, %cst_24 [2] : vector<4x8x8xf32> to vector<4x8xf32>
    %81 = vector.shape_cast %80 : vector<4x8xf32> to vector<4x8x1xf32>
    %82 = tpu.reciprocal %81 {approx = true} : vector<4x8x1xf32> -> vector<4x8x1xf32>
    %83 = vector.broadcast %82 : vector<4x8x1xf32> to vector<4x8x8xf32>
    %84 = arith.mulf %79, %83 : vector<4x8x8xf32>
    "tpu.trace_start"() <{level = 10 : i32, message = "gij,gjd->gid"}> : () -> ()
    %cst_25 = arith.constant dense<0.000000e+00> : vector<4x8x16xf32>
    %85 = tpu.matmul %84, %71, %cst_25 {dimension_numbers = #tpu.dot_dimension_numbers<[2], [1], [1], [2], [0, 0, 0, 1, 1, 2], [0], [0]>} : vector<4x8x8xf32>, vector<4x8x16xf32>, vector<4x8x16xf32> -> vector<4x8x16xf32>
    "tpu.trace_stop"() : () -> ()
    %86 = vector.extract_strided_slice %85 {offsets = [0, 0, 0], sizes = [2, 8, 16], strides = [1, 1, 1]} : vector<4x8x16xf32> to vector<2x8x16xf32>
    %87 = vector.shape_cast %86 : vector<2x8x16xf32> to vector<16x16xf32>
    %88 = vector.extract_strided_slice %85 {offsets = [2, 0, 0], sizes = [2, 8, 16], strides = [1, 1, 1]} : vector<4x8x16xf32> to vector<2x8x16xf32>
    %89 = vector.shape_cast %88 : vector<2x8x16xf32> to vector<16x16xf32>
    %90 = tpu.concatenate %87, %89 in 1 : vector<16x16xf32>, vector<16x16xf32> -> vector<16x32xf32>
    %91 = arith.truncf %90 : vector<16x32xf32> to vector<16x32xbf16>
    %c0_26 = arith.constant 0 : index
    %c0_27 = arith.constant 0 : index
    %c0_28 = arith.constant 0 : index
    %92 = vector.load %arg5[%c0_26, %c0_27, %c0_28] : memref<2x32x32xbf16, #tpu.memory_space<vmem>>, vector<1x32x32xbf16>
    %93 = vector.shape_cast %92 : vector<1x32x32xbf16> to vector<32x32xbf16>
    %cst_29 = arith.constant dense<0.000000e+00> : vector<16x32xf32>
    %94 = tpu.matmul %91, %93, %cst_29 {dimension_numbers = #tpu.dot_dimension_numbers<[1], [0], [0], [1], [0, 0, 1, 1], [], []>} : vector<16x32xbf16>, vector<32x32xbf16>, vector<16x32xf32> -> vector<16x32xf32>
    %95 = arith.addf %0, %94 : vector<16x32xf32>
    %c0_30 = arith.constant 0 : index
    %c0_31 = arith.constant 0 : index
    %c0_32 = arith.constant 0 : index
    %96 = vector.load %arg6[%c0_30, %c0_31, %c0_32] : memref<2x1x32xf32, #tpu.memory_space<vmem>>, vector<1x1x32xf32>
    %97 = vector.shape_cast %96 : vector<1x1x32xf32> to vector<1x32xf32>
    %cst_33 = arith.constant dense<0.000000e+00> : vector<16xf32>
    %98 = vector.multi_reduction <add>, %95, %cst_33 [1] : vector<16x32xf32> to vector<16xf32>
    %99 = vector.shape_cast %98 : vector<16xf32> to vector<16x1xf32>
    %cst_34 = arith.constant 3.200000e+01 : f32
    %100 = vector.broadcast %cst_34 : f32 to vector<16x1xf32>
    %101 = arith.divf %99, %100 : vector<16x1xf32>
    %102 = vector.broadcast %101 : vector<16x1xf32> to vector<16x32xf32>
    %103 = arith.subf %95, %102 : vector<16x32xf32>
    %104 = arith.mulf %103, %103 : vector<16x32xf32>
    %cst_35 = arith.constant dense<0.000000e+00> : vector<16xf32>
    %105 = vector.multi_reduction <add>, %104, %cst_35 [1] : vector<16x32xf32> to vector<16xf32>
    %106 = vector.shape_cast %105 : vector<16xf32> to vector<16x1xf32>
    %cst_36 = arith.constant 3.200000e+01 : f32
    %107 = vector.broadcast %cst_36 : f32 to vector<16x1xf32>
    %108 = arith.divf %106, %107 : vector<16x1xf32>
    %109 = vector.broadcast %101 : vector<16x1xf32> to vector<16x32xf32>
    %110 = arith.subf %95, %109 : vector<16x32xf32>
    %cst_37 = arith.constant 9.99999974E-6 : f32
    %111 = vector.broadcast %cst_37 : f32 to vector<16x1xf32>
    %112 = arith.addf %108, %111 : vector<16x1xf32>
    %113 = math.rsqrt %112 : vector<16x1xf32>
    %114 = vector.broadcast %113 : vector<16x1xf32> to vector<16x32xf32>
    %115 = arith.mulf %110, %114 : vector<16x32xf32>
    %116 = vector.broadcast %97 : vector<1x32xf32> to vector<16x32xf32>
    %117 = arith.mulf %115, %116 : vector<16x32xf32>
    %118 = arith.truncf %117 : vector<16x32xf32> to vector<16x32xbf16>
    %c0_38 = arith.constant 0 : index
    %c0_39 = arith.constant 0 : index
    %c0_40 = arith.constant 0 : index
    %119 = vector.load %arg7[%c0_38, %c0_39, %c0_40] : memref<2x32x128xbf16, #tpu.memory_space<vmem>>, vector<1x32x128xbf16>
    %120 = vector.shape_cast %119 : vector<1x32x128xbf16> to vector<32x128xbf16>
    %cst_41 = arith.constant dense<0.000000e+00> : vector<16x128xf32>
    %121 = tpu.matmul %118, %120, %cst_41 {dimension_numbers = #tpu.dot_dimension_numbers<[1], [0], [0], [1], [0, 0, 1, 1], [], []>} : vector<16x32xbf16>, vector<32x128xbf16>, vector<16x128xf32> -> vector<16x128xf32>
    %c64_i32 = arith.constant 64 : i32
    %122 = tpu.dynamic_rotate %121 by %c64_i32 dim 1 : vector<16x128xf32>, i32 -> vector<16x128xf32>
    %123 = arith.mulf %122, %122 : vector<16x128xf32>
    %124 = arith.mulf %122, %123 : vector<16x128xf32>
    %cst_42 = arith.constant 4.471500e-02 : f32
    %125 = vector.broadcast %cst_42 : f32 to vector<16x128xf32>
    %126 = arith.mulf %125, %124 : vector<16x128xf32>
    %127 = arith.addf %122, %126 : vector<16x128xf32>
    %cst_43 = arith.constant 0.797884583 : f32
    %128 = vector.broadcast %cst_43 : f32 to vector<16x128xf32>
    %129 = arith.mulf %128, %127 : vector<16x128xf32>
    %130 = math.tanh %129 : vector<16x128xf32>
    %cst_44 = arith.constant 1.000000e+00 : f32
    %131 = vector.broadcast %cst_44 : f32 to vector<16x128xf32>
    %132 = arith.addf %131, %130 : vector<16x128xf32>
    %cst_45 = arith.constant 5.000000e-01 : f32
    %133 = vector.broadcast %cst_45 : f32 to vector<16x128xf32>
    %134 = arith.mulf %133, %132 : vector<16x128xf32>
    %135 = arith.mulf %122, %134 : vector<16x128xf32>
    %136 = arith.mulf %135, %121 : vector<16x128xf32>
    %137 = arith.truncf %136 : vector<16x128xf32> to vector<16x128xbf16>
    %c0_46 = arith.constant 0 : index
    %c0_47 = arith.constant 0 : index
    %c0_48 = arith.constant 0 : index
    %138 = vector.load %arg8[%c0_46, %c0_47, %c0_48] : memref<2x128x32xbf16, #tpu.memory_space<vmem>>, vector<1x128x32xbf16>
    %139 = vector.shape_cast %138 : vector<1x128x32xbf16> to vector<128x32xbf16>
    %cst_49 = arith.constant dense<0.000000e+00> : vector<16x32xf32>
    %140 = tpu.matmul %137, %139, %cst_49 {dimension_numbers = #tpu.dot_dimension_numbers<[1], [0], [0], [1], [0, 0, 1, 1], [], []>} : vector<16x128xbf16>, vector<128x32xbf16>, vector<16x32xf32> -> vector<16x32xf32>
    %141 = arith.addf %95, %140 : vector<16x32xf32>
    %c1 = arith.constant 1 : index
    %c0_50 = arith.constant 0 : index
    %c0_51 = arith.constant 0 : index
    %142 = vector.load %arg2[%c1, %c0_50, %c0_51] : memref<2x1x32xf32, #tpu.memory_space<vmem>>, vector<1x1x32xf32>
    %143 = vector.shape_cast %142 : vector<1x1x32xf32> to vector<1x32xf32>
    %cst_52 = arith.constant dense<0.000000e+00> : vector<16xf32>
    %144 = vector.multi_reduction <add>, %141, %cst_52 [1] : vector<16x32xf32> to vector<16xf32>
    %145 = vector.shape_cast %144 : vector<16xf32> to vector<16x1xf32>
    %cst_53 = arith.constant 3.200000e+01 : f32
    %146 = vector.broadcast %cst_53 : f32 to vector<16x1xf32>
    %147 = arith.divf %145, %146 : vector<16x1xf32>
    %148 = vector.broadcast %147 : vector<16x1xf32> to vector<16x32xf32>
    %149 = arith.subf %141, %148 : vector<16x32xf32>
    %150 = arith.mulf %149, %149 : vector<16x32xf32>
    %cst_54 = arith.constant dense<0.000000e+00> : vector<16xf32>
    %151 = vector.multi_reduction <add>, %150, %cst_54 [1] : vector<16x32xf32> to vector<16xf32>
    %152 = vector.shape_cast %151 : vector<16xf32> to vector<16x1xf32>
    %cst_55 = arith.constant 3.200000e+01 : f32
    %153 = vector.broadcast %cst_55 : f32 to vector<16x1xf32>
    %154 = arith.divf %152, %153 : vector<16x1xf32>
    %155 = vector.broadcast %147 : vector<16x1xf32> to vector<16x32xf32>
    %156 = arith.subf %141, %155 : vector<16x32xf32>
    %cst_56 = arith.constant 9.99999974E-6 : f32
    %157 = vector.broadcast %cst_56 : f32 to vector<16x1xf32>
    %158 = arith.addf %154, %157 : vector<16x1xf32>
    %159 = math.rsqrt %158 : vector<16x1xf32>
    %160 = vector.broadcast %159 : vector<16x1xf32> to vector<16x32xf32>
    %161 = arith.mulf %156, %160 : vector<16x32xf32>
    %162 = vector.broadcast %143 : vector<1x32xf32> to vector<16x32xf32>
    %163 = arith.mulf %161, %162 : vector<16x32xf32>
    %164 = arith.truncf %163 : vector<16x32xf32> to vector<16x32xbf16>
    %c1_57 = arith.constant 1 : index
    %c0_58 = arith.constant 0 : index
    %c0_59 = arith.constant 0 : index
    %165 = vector.load %arg3[%c1_57, %c0_58, %c0_59] : memref<2x32x96xbf16, #tpu.memory_space<vmem>>, vector<1x32x96xbf16>
    %166 = vector.shape_cast %165 : vector<1x32x96xbf16> to vector<32x96xbf16>
    %cst_60 = arith.constant dense<0.000000e+00> : vector<16x96xf32>
    %167 = tpu.matmul %164, %166, %cst_60 {dimension_numbers = #tpu.dot_dimension_numbers<[1], [0], [0], [1], [0, 0, 1, 1], [], []>} : vector<16x32xbf16>, vector<32x96xbf16>, vector<16x96xf32> -> vector<16x96xf32>
    %168 = vector.extract_strided_slice %167 {offsets = [0, 0], sizes = [16, 32], strides = [1, 1]} : vector<16x96xf32> to vector<16x32xf32>
    %169 = vector.extract_strided_slice %167 {offsets = [0, 32], sizes = [16, 32], strides = [1, 1]} : vector<16x96xf32> to vector<16x32xf32>
    %170 = vector.extract_strided_slice %167 {offsets = [0, 64], sizes = [16, 32], strides = [1, 1]} : vector<16x96xf32> to vector<16x32xf32>
    %c1_61 = arith.constant 1 : index
    %c0_62 = arith.constant 0 : index
    %c0_63 = arith.constant 0 : index
    %171 = vector.load %arg4[%c1_61, %c0_62, %c0_63] : memref<2x2x16xf32, #tpu.memory_space<vmem>>, vector<1x2x16xf32>
    %172 = vector.shape_cast %171 : vector<1x2x16xf32> to vector<2x16xf32>
    %173 = vector.extract_strided_slice %168 {offsets = [0, 0], sizes = [16, 16], strides = [1, 1]} : vector<16x32xf32> to vector<16x16xf32>
    %174 = vector.shape_cast %173 : vector<16x16xf32> to vector<2x8x16xf32>
    %175 = vector.extract_strided_slice %168 {offsets = [0, 16], sizes = [16, 16], strides = [1, 1]} : vector<16x32xf32> to vector<16x16xf32>
    %176 = vector.shape_cast %175 : vector<16x16xf32> to vector<2x8x16xf32>
    %177 = tpu.concatenate %174, %176 in 0 : vector<2x8x16xf32>, vector<2x8x16xf32> -> vector<4x8x16xf32>
    %178 = arith.mulf %177, %177 : vector<4x8x16xf32>
    %cst_64 = arith.constant dense<0.000000e+00> : vector<4x8xf32>
    %179 = vector.multi_reduction <add>, %178, %cst_64 [2] : vector<4x8x16xf32> to vector<4x8xf32>
    %180 = vector.shape_cast %179 : vector<4x8xf32> to vector<4x8x1xf32>
    %cst_65 = arith.constant 9.99999996E-13 : f32
    %181 = vector.broadcast %cst_65 : f32 to vector<4x8x1xf32>
    %182 = arith.addf %180, %181 : vector<4x8x1xf32>
    %183 = math.rsqrt %182 : vector<4x8x1xf32>
    %184 = vector.broadcast %183 : vector<4x8x1xf32> to vector<4x8x16xf32>
    %185 = arith.mulf %177, %184 : vector<4x8x16xf32>
    %186 = vector.extract_strided_slice %172 {offsets = [0, 0], sizes = [1, 16], strides = [1, 1]} : vector<2x16xf32> to vector<1x16xf32>
    %187 = vector.shape_cast %186 : vector<1x16xf32> to vector<1x1x16xf32>
    %188 = vector.broadcast %187 : vector<1x1x16xf32> to vector<4x8x16xf32>
    %189 = arith.mulf %185, %188 : vector<4x8x16xf32>
    %190 = vector.extract_strided_slice %169 {offsets = [0, 0], sizes = [16, 16], strides = [1, 1]} : vector<16x32xf32> to vector<16x16xf32>
    %191 = vector.shape_cast %190 : vector<16x16xf32> to vector<2x8x16xf32>
    %192 = vector.extract_strided_slice %169 {offsets = [0, 16], sizes = [16, 16], strides = [1, 1]} : vector<16x32xf32> to vector<16x16xf32>
    %193 = vector.shape_cast %192 : vector<16x16xf32> to vector<2x8x16xf32>
    %194 = tpu.concatenate %191, %193 in 0 : vector<2x8x16xf32>, vector<2x8x16xf32> -> vector<4x8x16xf32>
    %195 = arith.mulf %194, %194 : vector<4x8x16xf32>
    %cst_66 = arith.constant dense<0.000000e+00> : vector<4x8xf32>
    %196 = vector.multi_reduction <add>, %195, %cst_66 [2] : vector<4x8x16xf32> to vector<4x8xf32>
    %197 = vector.shape_cast %196 : vector<4x8xf32> to vector<4x8x1xf32>
    %cst_67 = arith.constant 9.99999996E-13 : f32
    %198 = vector.broadcast %cst_67 : f32 to vector<4x8x1xf32>
    %199 = arith.addf %197, %198 : vector<4x8x1xf32>
    %200 = math.rsqrt %199 : vector<4x8x1xf32>
    %201 = vector.broadcast %200 : vector<4x8x1xf32> to vector<4x8x16xf32>
    %202 = arith.mulf %194, %201 : vector<4x8x16xf32>
    %203 = vector.extract_strided_slice %172 {offsets = [1, 0], sizes = [1, 16], strides = [1, 1]} : vector<2x16xf32> to vector<1x16xf32>
    %204 = vector.shape_cast %203 : vector<1x16xf32> to vector<1x1x16xf32>
    %205 = vector.broadcast %204 : vector<1x1x16xf32> to vector<4x8x16xf32>
    %206 = arith.mulf %202, %205 : vector<4x8x16xf32>
    %207 = vector.extract_strided_slice %170 {offsets = [0, 0], sizes = [16, 16], strides = [1, 1]} : vector<16x32xf32> to vector<16x16xf32>
    %208 = vector.shape_cast %207 : vector<16x16xf32> to vector<2x8x16xf32>
    %209 = vector.extract_strided_slice %170 {offsets = [0, 16], sizes = [16, 16], strides = [1, 1]} : vector<16x32xf32> to vector<16x16xf32>
    %210 = vector.shape_cast %209 : vector<16x16xf32> to vector<2x8x16xf32>
    %211 = tpu.concatenate %208, %210 in 0 : vector<2x8x16xf32>, vector<2x8x16xf32> -> vector<4x8x16xf32>
    "tpu.trace_start"() <{level = 10 : i32, message = "gid,gjd->gij"}> : () -> ()
    %cst_68 = arith.constant dense<0.000000e+00> : vector<4x8x8xf32>
    %212 = tpu.matmul %189, %206, %cst_68 {dimension_numbers = #tpu.dot_dimension_numbers<[2], [2], [1], [1], [0, 0, 0, 1, 1, 1], [0], [0]>} : vector<4x8x16xf32>, vector<4x8x16xf32>, vector<4x8x8xf32> -> vector<4x8x8xf32>
    "tpu.trace_stop"() : () -> ()
    %213 = vector.broadcast %1 : vector<4x1x8xf32> to vector<4x8x8xf32>
    %214 = arith.addf %212, %213 : vector<4x8x8xf32>
    %cst_69 = arith.constant dense<0xFF800000> : vector<4x8xf32>
    %215 = vector.multi_reduction <maximumf>, %214, %cst_69 [2] : vector<4x8x8xf32> to vector<4x8xf32>
    %216 = vector.shape_cast %215 : vector<4x8xf32> to vector<4x8x1xf32>
    %217 = vector.broadcast %216 : vector<4x8x1xf32> to vector<4x8x8xf32>
    %218 = arith.subf %214, %217 : vector<4x8x8xf32>
    %219 = math.exp %218 : vector<4x8x8xf32>
    %cst_70 = arith.constant dense<0.000000e+00> : vector<4x8xf32>
    %220 = vector.multi_reduction <add>, %219, %cst_70 [2] : vector<4x8x8xf32> to vector<4x8xf32>
    %221 = vector.shape_cast %220 : vector<4x8xf32> to vector<4x8x1xf32>
    %222 = tpu.reciprocal %221 {approx = true} : vector<4x8x1xf32> -> vector<4x8x1xf32>
    %223 = vector.broadcast %222 : vector<4x8x1xf32> to vector<4x8x8xf32>
    %224 = arith.mulf %219, %223 : vector<4x8x8xf32>
    "tpu.trace_start"() <{level = 10 : i32, message = "gij,gjd->gid"}> : () -> ()
    %cst_71 = arith.constant dense<0.000000e+00> : vector<4x8x16xf32>
    %225 = tpu.matmul %224, %211, %cst_71 {dimension_numbers = #tpu.dot_dimension_numbers<[2], [1], [1], [2], [0, 0, 0, 1, 1, 2], [0], [0]>} : vector<4x8x8xf32>, vector<4x8x16xf32>, vector<4x8x16xf32> -> vector<4x8x16xf32>
    "tpu.trace_stop"() : () -> ()
    %226 = vector.extract_strided_slice %225 {offsets = [0, 0, 0], sizes = [2, 8, 16], strides = [1, 1, 1]} : vector<4x8x16xf32> to vector<2x8x16xf32>
    %227 = vector.shape_cast %226 : vector<2x8x16xf32> to vector<16x16xf32>
    %228 = vector.extract_strided_slice %225 {offsets = [2, 0, 0], sizes = [2, 8, 16], strides = [1, 1, 1]} : vector<4x8x16xf32> to vector<2x8x16xf32>
    %229 = vector.shape_cast %228 : vector<2x8x16xf32> to vector<16x16xf32>
    %230 = tpu.concatenate %227, %229 in 1 : vector<16x16xf32>, vector<16x16xf32> -> vector<16x32xf32>
    %231 = arith.truncf %230 : vector<16x32xf32> to vector<16x32xbf16>
    %c1_72 = arith.constant 1 : index
    %c0_73 = arith.constant 0 : index
    %c0_74 = arith.constant 0 : index
    %232 = vector.load %arg5[%c1_72, %c0_73, %c0_74] : memref<2x32x32xbf16, #tpu.memory_space<vmem>>, vector<1x32x32xbf16>
    %233 = vector.shape_cast %232 : vector<1x32x32xbf16> to vector<32x32xbf16>
    %cst_75 = arith.constant dense<0.000000e+00> : vector<16x32xf32>
    %234 = tpu.matmul %231, %233, %cst_75 {dimension_numbers = #tpu.dot_dimension_numbers<[1], [0], [0], [1], [0, 0, 1, 1], [], []>} : vector<16x32xbf16>, vector<32x32xbf16>, vector<16x32xf32> -> vector<16x32xf32>
    %235 = arith.addf %141, %234 : vector<16x32xf32>
    %c1_76 = arith.constant 1 : index
    %c0_77 = arith.constant 0 : index
    %c0_78 = arith.constant 0 : index
    %236 = vector.load %arg6[%c1_76, %c0_77, %c0_78] : memref<2x1x32xf32, #tpu.memory_space<vmem>>, vector<1x1x32xf32>
    %237 = vector.shape_cast %236 : vector<1x1x32xf32> to vector<1x32xf32>
    %cst_79 = arith.constant dense<0.000000e+00> : vector<16xf32>
    %238 = vector.multi_reduction <add>, %235, %cst_79 [1] : vector<16x32xf32> to vector<16xf32>
    %239 = vector.shape_cast %238 : vector<16xf32> to vector<16x1xf32>
    %cst_80 = arith.constant 3.200000e+01 : f32
    %240 = vector.broadcast %cst_80 : f32 to vector<16x1xf32>
    %241 = arith.divf %239, %240 : vector<16x1xf32>
    %242 = vector.broadcast %241 : vector<16x1xf32> to vector<16x32xf32>
    %243 = arith.subf %235, %242 : vector<16x32xf32>
    %244 = arith.mulf %243, %243 : vector<16x32xf32>
    %cst_81 = arith.constant dense<0.000000e+00> : vector<16xf32>
    %245 = vector.multi_reduction <add>, %244, %cst_81 [1] : vector<16x32xf32> to vector<16xf32>
    %246 = vector.shape_cast %245 : vector<16xf32> to vector<16x1xf32>
    %cst_82 = arith.constant 3.200000e+01 : f32
    %247 = vector.broadcast %cst_82 : f32 to vector<16x1xf32>
    %248 = arith.divf %246, %247 : vector<16x1xf32>
    %249 = vector.broadcast %241 : vector<16x1xf32> to vector<16x32xf32>
    %250 = arith.subf %235, %249 : vector<16x32xf32>
    %cst_83 = arith.constant 9.99999974E-6 : f32
    %251 = vector.broadcast %cst_83 : f32 to vector<16x1xf32>
    %252 = arith.addf %248, %251 : vector<16x1xf32>
    %253 = math.rsqrt %252 : vector<16x1xf32>
    %254 = vector.broadcast %253 : vector<16x1xf32> to vector<16x32xf32>
    %255 = arith.mulf %250, %254 : vector<16x32xf32>
    %256 = vector.broadcast %237 : vector<1x32xf32> to vector<16x32xf32>
    %257 = arith.mulf %255, %256 : vector<16x32xf32>
    %258 = arith.truncf %257 : vector<16x32xf32> to vector<16x32xbf16>
    %c1_84 = arith.constant 1 : index
    %c0_85 = arith.constant 0 : index
    %c0_86 = arith.constant 0 : index
    %259 = vector.load %arg7[%c1_84, %c0_85, %c0_86] : memref<2x32x128xbf16, #tpu.memory_space<vmem>>, vector<1x32x128xbf16>
    %260 = vector.shape_cast %259 : vector<1x32x128xbf16> to vector<32x128xbf16>
    %cst_87 = arith.constant dense<0.000000e+00> : vector<16x128xf32>
    %261 = tpu.matmul %258, %260, %cst_87 {dimension_numbers = #tpu.dot_dimension_numbers<[1], [0], [0], [1], [0, 0, 1, 1], [], []>} : vector<16x32xbf16>, vector<32x128xbf16>, vector<16x128xf32> -> vector<16x128xf32>
    %c64_i32_88 = arith.constant 64 : i32
    %262 = tpu.dynamic_rotate %261 by %c64_i32_88 dim 1 : vector<16x128xf32>, i32 -> vector<16x128xf32>
    %263 = arith.mulf %262, %262 : vector<16x128xf32>
    %264 = arith.mulf %262, %263 : vector<16x128xf32>
    %cst_89 = arith.constant 4.471500e-02 : f32
    %265 = vector.broadcast %cst_89 : f32 to vector<16x128xf32>
    %266 = arith.mulf %265, %264 : vector<16x128xf32>
    %267 = arith.addf %262, %266 : vector<16x128xf32>
    %cst_90 = arith.constant 0.797884583 : f32
    %268 = vector.broadcast %cst_90 : f32 to vector<16x128xf32>
    %269 = arith.mulf %268, %267 : vector<16x128xf32>
    %270 = math.tanh %269 : vector<16x128xf32>
    %cst_91 = arith.constant 1.000000e+00 : f32
    %271 = vector.broadcast %cst_91 : f32 to vector<16x128xf32>
    %272 = arith.addf %271, %270 : vector<16x128xf32>
    %cst_92 = arith.constant 5.000000e-01 : f32
    %273 = vector.broadcast %cst_92 : f32 to vector<16x128xf32>
    %274 = arith.mulf %273, %272 : vector<16x128xf32>
    %275 = arith.mulf %262, %274 : vector<16x128xf32>
    %276 = arith.mulf %275, %261 : vector<16x128xf32>
    %277 = arith.truncf %276 : vector<16x128xf32> to vector<16x128xbf16>
    %c1_93 = arith.constant 1 : index
    %c0_94 = arith.constant 0 : index
    %c0_95 = arith.constant 0 : index
    %278 = vector.load %arg8[%c1_93, %c0_94, %c0_95] : memref<2x128x32xbf16, #tpu.memory_space<vmem>>, vector<1x128x32xbf16>
    %279 = vector.shape_cast %278 : vector<1x128x32xbf16> to vector<128x32xbf16>
    %cst_96 = arith.constant dense<0.000000e+00> : vector<16x32xf32>
    %280 = tpu.matmul %277, %279, %cst_96 {dimension_numbers = #tpu.dot_dimension_numbers<[1], [0], [0], [1], [0, 0, 1, 1], [], []>} : vector<16x128xbf16>, vector<128x32xbf16>, vector<16x32xf32> -> vector<16x32xf32>
    %281 = arith.addf %235, %280 : vector<16x32xf32>
    %282 = vector.shape_cast %281 : vector<16x32xf32> to vector<2x8x32xf32>
    %283 = vector.extract_strided_slice %282 {offsets = [0, 0, 0], sizes = [2, 1, 32], strides = [1, 1, 1]} : vector<2x8x32xf32> to vector<2x1x32xf32>
    %284 = vector.shape_cast %283 : vector<2x1x32xf32> to vector<2x32xf32>
    %c0_97 = arith.constant 0 : index
    %c0_98 = arith.constant 0 : index
    %285 = vector.load %arg9[%c0_97, %c0_98] : memref<1x32xf32, #tpu.memory_space<vmem>>, vector<1x32xf32>
    %cst_99 = arith.constant dense<0.000000e+00> : vector<2xf32>
    %286 = vector.multi_reduction <add>, %284, %cst_99 [1] : vector<2x32xf32> to vector<2xf32>
    %287 = vector.shape_cast %286 : vector<2xf32> to vector<2x1xf32>
    %cst_100 = arith.constant 3.200000e+01 : f32
    %288 = vector.broadcast %cst_100 : f32 to vector<2x1xf32>
    %289 = arith.divf %287, %288 : vector<2x1xf32>
    %290 = vector.broadcast %289 : vector<2x1xf32> to vector<2x32xf32>
    %291 = arith.subf %284, %290 : vector<2x32xf32>
    %292 = arith.mulf %291, %291 : vector<2x32xf32>
    %cst_101 = arith.constant dense<0.000000e+00> : vector<2xf32>
    %293 = vector.multi_reduction <add>, %292, %cst_101 [1] : vector<2x32xf32> to vector<2xf32>
    %294 = vector.shape_cast %293 : vector<2xf32> to vector<2x1xf32>
    %cst_102 = arith.constant 3.200000e+01 : f32
    %295 = vector.broadcast %cst_102 : f32 to vector<2x1xf32>
    %296 = arith.divf %294, %295 : vector<2x1xf32>
    %297 = vector.broadcast %289 : vector<2x1xf32> to vector<2x32xf32>
    %298 = arith.subf %284, %297 : vector<2x32xf32>
    %cst_103 = arith.constant 9.99999974E-6 : f32
    %299 = vector.broadcast %cst_103 : f32 to vector<2x1xf32>
    %300 = arith.addf %296, %299 : vector<2x1xf32>
    %301 = math.rsqrt %300 : vector<2x1xf32>
    %302 = vector.broadcast %301 : vector<2x1xf32> to vector<2x32xf32>
    %303 = arith.mulf %298, %302 : vector<2x32xf32>
    %304 = vector.broadcast %285 : vector<1x32xf32> to vector<2x32xf32>
    %305 = arith.mulf %303, %304 : vector<2x32xf32>
    %c0_104 = arith.constant 0 : index
    %c0_105 = arith.constant 0 : index
    %306 = vector.load %arg10[%c0_104, %c0_105] : memref<2x32xf32, #tpu.memory_space<vmem>>, vector<2x32xf32>
    tpu.vector_store %arg10[%c0_104, %c0_105], %305 {strides = array<i32>} : memref<2x32xf32, #tpu.memory_space<vmem>>, vector<2x32xf32>,
    return
  }
}

</mosaic_0001>

<bundles_post_ra>
// kernel: tpu_custom_call.1
= control target key start
LH: loop header
LB: loop body
LE: loop exit
PB: predicated region body
PF: predicated region fallthrough
CT: control target
= control target key end

     0   :  { %vm44_vm0 = vcmask 261120   ;;  %s3476_s0 = inlined_call_operand.vmem [shape: f32[16,32], index: 0, kind: input, shape index: {}]   ;;  %s3477_s1 = inlined_call_operand.vmem [shape: f32[4,1,8], index: 1, kind: input, shape index: {}]   ;;  %s3478_s2 = inlined_call_operand.vmem [shape: f32[2,1,32], index: 2, kind: input, shape index: {}]   ;;  %s3479_s3 = inlined_call_operand.vmem [shape: bf16[2,32,96], index: 3, kind: input, shape index: {}]   ;;  %s3480_s4 = inlined_call_operand.vmem [shape: f32[2,2,16], index: 4, kind: input, shape index: {}]   ;;  %s3481_s5 = inlined_call_operand.vmem [shape: bf16[2,32,32], index: 5, kind: input, shape index: {}]   ;;  %s3482_s6 = inlined_call_operand.vmem [shape: f32[2,1,32], index: 6, kind: input, shape index: {}]   ;;  %s3483_s7 = inlined_call_operand.vmem [shape: bf16[2,32,128], index: 7, kind: input, shape index: {}]   ;;  %s3484_s8 = inlined_call_operand.vmem [shape: bf16[2,128,32], index: 8, kind: input, shape index: {}]   ;;  %s3485_s9 = inlined_call_operand.vmem [shape: f32[1,32], index: 9, kind: input, shape index: {}]   ;;  %s3486_s10 = inlined_call_operand.hbm [shape: f32[2,32], index: 10, kind: output, shape index: {}]  }
   0x1   :  { %v3009_v0 = vld [vmem:[%s3476_s0] sm:$0xff]  ;;  %v3014_v1 = vld [vmem:[%s3476_s0 + $0x8] sm:$0xff] }
   0x2   :  { %v45_v2 = vsel %vm44_vm0, %v3009_v0, 0.0  ;;  %v48_v3 = vsel %vm44_vm0, %v3014_v1, 0.0 }
   0x3   :  { %46 = vadd.xlane.f32.xlu0 %v45_v2 }
   0x7   :  { %49 = vadd.xlane.f32.xlu0 %v48_v3 }
   0x8   :  { %15 = vsyncpa [#allocation3], 0  ;;  %v2803_v14 = vld [vmem:[%s3479_s3 + $0x8] sm:$0xff]   ;;  %v2943_v15 = vmov 0.0   ;;  %vm2944_vm1 = vmmov 0   ;;  %v2804_v16 = vld [vmem:[%s3479_s3] sm:$0xff]   ;;  %v179_v53 = vlaneseq }
   0x9   :  { %2617 = vmatprep.subr.bf16.mxu0 %v2943_v15  ;;  %2621 = vmatprep.mubr.msk.bf16.mxu0 %vm2944_vm1, %v2943_v15  ;;  %v2451_v26 = vld [vmem:[%s3478_s2] ss:$0 sm:$0xff]  ;;  %s2945_s22 = smov 112   ;;  %s2946_s23 = smov 96   ;;  %vm154_vm2 = vcmask 130048   ;;  %vm575_vm3 = vcmask 64512  }
   0xa   :  { %2618 = vmatpush3.bf16.msra.mxu0 %v2803_v14  ;;  %2625 = vmatprep.subr.mxu1 %v2943_v15  ;;  %v3076_v54 = vshrl.u32 %v179_v53, 7  ;;  %v141_v56 = vld [vmem:[%s3480_s4] sm:$0x3]  ;;  %s2947_s26 = smov 32   ;;  %s2948_s15 = smov 64   ;;  %vm2390_vm4 = vcmask 1041409  }
   0xb   :  { %2619 = vmatprep.subr.bf16.mxu0 %v2943_v15  ;;  %2627 = vmatprep.mubr.msk.f32.mxu1 %vm2944_vm1, %v2943_v15  ;;  %s2949_s18 = smov 16   ;;  %vm2393_vm5 = vcmask 254976  }
   0xc   :  { %v229_v55 = vsub.s32 1, %v3076_v54 }
   0xe   :  { %2620 = vmatpush3.bf16.msra.mxu0 %v2804_v16  ;;  %v230_v57 = vrot.slane %v141_v56, %v229_v55 }
   0xf   :  { %2640 = vmatprep.subr.mxu0 %v2943_v15 }
  0x8c   :  { %v47_v4 = vpop.xlane.xlu0 %46 }
  0x8d   :  { %v52_v5 = vmul.f32 0.03125, %v47_v4 }
  0x8f   :  { %v54_v6 = vsub.f32 %v3009_v0, %v52_v5 }
  0x90   :  { %v50_v7 = vpop.xlane.xlu0 %49 }
  0x91   :  { %v53_v8 = vmul.f32 0.03125, %v50_v7  ;;  %v56_v9 = vmul.f32 %v54_v6, %v54_v6 }
  0x93   :  { %v55_v10 = vsub.f32 %v3014_v1, %v53_v8  ;;  %v58_v11 = vsel %vm44_vm0, %v56_v9, 0.0 }
  0x94   :  { %59 = vadd.xlane.f32.xlu1 %v58_v11 }
  0x95   :  { %v57_v12 = vmul.f32 %v55_v10, %v55_v10 }
  0x97   :  { %v61_v13 = vsel %vm44_vm0, %v57_v12, 0.0 }
  0x98   :  { %62 = vadd.xlane.f32.xlu1 %v61_v13 }
 0x11d   :  { %v60_v17 = vpop.xlane.xlu1 %59 }
 0x11e   :  { %v64_v18 = vmul.f32 0.03125, %v60_v17 }
 0x120   :  { %v66_v19 = vadd.f32 1e-05, %v64_v18 }
 0x121   :  { %v63_v20 = vpop.xlane.xlu1 %62 }
 0x122   :  { %2831 = vrsqrt.f32 %v66_v19  ;;  %v65_v21 = vmul.f32 0.03125, %v63_v20 }
 0x124   :  { %v67_v22 = vadd.f32 1e-05, %v65_v21 }
 0x126   :  { %2833 = vrsqrt.f32 %v67_v22 }
 0x12f   :  { %v2832_v23 = vpop.eup %2831 }
 0x130   :  { %v70_v24 = vmul.f32 %v2832_v23, %v54_v6 }
 0x132   :  { %v78_v28 = vmul.f32 %v2451_v26, %v70_v24 }
 0x133   :  { %v2834_v25 = vpop.eup %2833 }
 0x134   :  { %v71_v27 = vmul.f32 %v2834_v25, %v55_v10 }
 0x136   :  { %v79_v29 = vmul.f32 %v2451_v26, %v71_v27  ;;  %v181_v26 = vsub.s32 0, %v3076_v54 }
 0x138   :  { %v80_v30 = vpack.c.bf16 %v79_v29, %v78_v28  ;;  %v182_v28 = vrot.slane %v141_v56, %v181_v26 }
 0x13a   :  { %2622 = vmatmul.mubr.msk.bf16.vlgmr.msra.gmra.mxu0 %vm44_vm0, %v80_v30 }
 0x13b   :  { %2642 = vmatprep.mubr.msk.f32.mxu0 %vm2944_vm1, %v2943_v15 }
 0x1fa   :  { %v3044_v31 = vpop.f32.mrf.mxu0 }
 0x1fb   :  { %144 = vrot.lane.b32.xlu0 %v3044_v31, %s2945_s22  ;;  %v150_v35 = vmul.f32 %v3044_v31, %v3044_v31 }
 0x1fc   :  { %v2623_v32 = vpop.f32.mrf.mxu0 }
 0x1fd   :  { %v155_v45 = vsel %vm154_vm2, %v150_v35, 0.0 }
 0x1fe   :  { %v3048_v33 = vpop.f32.mrf.mxu0 }
 0x1ff   :  { %146 = vrot.lane.b32.xlu1 %v3048_v33, %s2945_s22  ;;  %v151_v36 = vmul.f32 %v3048_v33, %v3048_v33 }
 0x200   :  { %v2624_v34 = vpop.f32.mrf.mxu0 }
 0x201   :  { %v158_v46 = vsel %vm154_vm2, %v151_v36, 0.0 }
 0x203   :  { %191 = vrot.lane.b32.xlu1 %v150_v35, %s2946_s23 }
 0x207   :  { %193 = vrot.lane.b32.xlu1 %v151_v36, %s2946_s23 }
 0x26d   :  { %v3058_v37 = vpop.permute.xlu0 %144 }
 0x26e   :  { %v152_v38 = vmul.f32 %v3058_v37, %v3058_v37 }
 0x270   :  { %195 = vrot.lane.b32.xlu0 %v152_v38, %s2946_s23  ;;  %v161_v47 = vsel %vm154_vm2, %v152_v38, 0.0 }
 0x271   :  { %v3063_v39 = vpop.permute.xlu1 %146 }
 0x272   :  { %v153_v40 = vmul.f32 %v3063_v39, %v3063_v39 }
 0x274   :  { %197 = vrot.lane.b32.xlu1 %v153_v40, %s2946_s23  ;;  %v164_v48 = vsel %vm154_vm2, %v153_v40, 0.0 }
 0x275   :  { %v192_v41 = vpop.permute.xlu1 %191 }
 0x276   :  { %v203_v42 = vsel %vm154_vm2, %v192_v41, 0.0 }
 0x279   :  { %v194_v43 = vpop.permute.xlu1 %193 }
 0x27a   :  { %v206_v44 = vsel %vm154_vm2, %v194_v43, 0.0 }
 0x28f   :  { %204 = vadd.xlane.f32.xlu0 %v203_v42 }
 0x298   :  { %207 = vadd.xlane.f32.xlu1 %v206_v44 }
 0x29c   :  { %156 = vadd.xlane.f32.xlu1 %v155_v45 }
 0x2a0   :  { %159 = vadd.xlane.f32.xlu1 %v158_v46 }
 0x2a4   :  { %162 = vadd.xlane.f32.xlu1 %v161_v47 }
 0x2a8   :  { %165 = vadd.xlane.f32.xlu1 %v164_v48  ;;  %v3123_v48 = vld [vmem:[%s3477_s1] ss:$0 sm:$0xff] }
 0x2e2   :  { %v196_v49 = vpop.permute.xlu0 %195 }
 0x2e3   :  { %v209_v50 = vsel %vm154_vm2, %v196_v49, 0.0 }
 0x2e4   :  { %210 = vadd.xlane.f32.xlu0 %v209_v50 }
 0x2e6   :  { %v198_v51 = vpop.permute.xlu1 %197 }
 0x2e7   :  { %v212_v52 = vsel %vm154_vm2, %v198_v51, 0.0 }
 0x2e8   :  { %213 = vadd.xlane.f32.xlu0 %v212_v52  ;;  %v3129_v52 = vld [vmem:[%s3477_s1 + $0x1] ss:$0 sm:$0xff] }
 0x2fe   :  { %232 = vrot.lane.b32.xlu0 %v230_v57, %s2947_s26 }
 0x318   :  { %v205_v58 = vpop.xlane.xlu0 %204 }
 0x319   :  { %v215_v60 = vadd.f32 1e-12, %v205_v58 }
 0x31b   :  { %2835 = vrsqrt.f32 %v215_v60  ;;  %v3137_v60 = vld [vmem:[%s3477_s1 + $0x2] ss:$0 sm:$0xff] }
 0x321   :  { %v208_v59 = vpop.xlane.xlu1 %207 }
 0x322   :  { %v216_v61 = vadd.f32 1e-12, %v208_v59 }
 0x324   :  { %2837 = vrsqrt.f32 %v216_v61 }
 0x325   :  { %v157_v18 = vpop.xlane.xlu1 %156 }
 0x326   :  { %v167_v20 = vadd.f32 1e-12, %v157_v18 }
 0x328   :  { %v2836_v2 = vpop.eup %2835 }
 0x329   :  { %v223_v7 = vmul.f32 %v2836_v2, %v3044_v31  ;;  %v160_v19 = vpop.xlane.xlu1 %159  ;;  %v3143_v2 = vld [vmem:[%s3477_s1 + $0x3] ss:$0 sm:$0xff] }
 0x32a   :  { %v168_v21 = vadd.f32 1e-12, %v160_v19 }
 0x32d   :  { %v163_v22 = vpop.xlane.xlu1 %162 }
 0x32e   :  { %v169_v23 = vadd.f32 1e-12, %v163_v22 }
 0x331   :  { %v2838_v3 = vpop.eup %2837  ;;  %v166_v24 = vpop.xlane.xlu1 %165 }
 0x332   :  { %v224_v6 = vmul.f32 %v2838_v3, %v3048_v33  ;;  %v170_v25 = vadd.f32 1e-12, %v166_v24 }
 0x36d   :  { %v211_v62 = vpop.xlane.xlu0 %210 }
 0x36e   :  { %v217_v63 = vadd.f32 1e-12, %v211_v62 }
 0x370   :  { %2839 = vrsqrt.f32 %v217_v63 }
 0x371   :  { %v214_v4 = vpop.xlane.xlu0 %213 }
 0x372   :  { %v218_v5 = vadd.f32 1e-12, %v214_v4 }
 0x374   :  { %2841 = vrsqrt.f32 %v218_v5 }
 0x375   :  { %v233_v8 = vpop.permute.xlu0 %232  ;;  %2843 = vrsqrt.f32 %v167_v20 }
 0x376   :  { %v236_v9 = vmul.f32 %v233_v8, %v224_v6  ;;  %v235_v10 = vmul.f32 %v233_v8, %v223_v7  ;;  %2845 = vrsqrt.f32 %v168_v21 }
 0x377   :  { %2847 = vrsqrt.f32 %v169_v23 }
 0x378   :  { %342 = vrot.lane.b32.xlu0 %v236_v9, %s2946_s23  ;;  %264 = vrot.lane.b32.xlu1 %v235_v10, %s2946_s23  ;;  %2849 = vrsqrt.f32 %v170_v25 }
 0x37d   :  { %v2840_v11 = vpop.eup %2839 }
 0x37e   :  { %v225_v12 = vmul.f32 %v2840_v11, %v3058_v37 }
 0x380   :  { %v237_v13 = vmul.f32 %v233_v8, %v225_v12 }
 0x381   :  { %v2842_v14 = vpop.eup %2841 }
 0x382   :  { %420 = vrot.lane.b32.xlu0 %v237_v13, %s2946_s23  ;;  %v226_v16 = vmul.f32 %v2842_v14, %v3063_v39  ;;  %v2844_v27 = vpop.eup %2843 }
 0x383   :  { %v175_v29 = vmul.f32 %v2844_v27, %v3044_v31  ;;  %v2846_v30 = vpop.eup %2845 }
 0x384   :  { %v238_v17 = vmul.f32 %v233_v8, %v226_v16  ;;  %v176_v35 = vmul.f32 %v2846_v30, %v3048_v33  ;;  %v2848_v38 = vpop.eup %2847 }
 0x385   :  { %v183_v34 = vmul.f32 %v182_v28, %v175_v29  ;;  %v177_v41 = vmul.f32 %v2848_v38, %v3058_v37  ;;  %v2850_v42 = vpop.eup %2849 }
 0x386   :  { %498 = vrot.lane.b32.xlu0 %v238_v17, %s2946_s23  ;;  %v184_v40 = vmul.f32 %v182_v28, %v176_v35  ;;  %v178_v45 = vmul.f32 %v2850_v42, %v3063_v39 }
 0x387   :  { %v185_v44 = vmul.f32 %v182_v28, %v177_v41 }
 0x388   :  { %v186_v47 = vmul.f32 %v182_v28, %v178_v45 }
 0x3ea   :  { %v265_v32 = vpop.permute.xlu1 %264  ;;  %v343_v36 = vpop.permute.xlu0 %342 }
 0x3eb   :  { %2626 = vmatpush3.xpose.msk.msra.mxu1 %vm154_vm2, %v265_v32 }
 0x3ec   :  { %2630 = vmatprep.subr.mxu1 %v2943_v15 }
 0x3ee   :  { %2628 = vmatmul.mubr.msk.f32.vlgmr.msra.gmra.mxu1 %vm154_vm2, %v183_v34 }
 0x3ef   :  { %2631 = vmatpush3.xpose.msk.msra.mxu1 %vm154_vm2, %v343_v36  ;;  %2632 = vmatprep.mubr.msk.f32.mxu1 %vm2944_vm1, %v2943_v15 }
 0x3f0   :  { %2635 = vmatprep.subr.mxu1 %v2943_v15 }
 0x3f2   :  { %2633 = vmatmul.mubr.msk.f32.vlgmr.msra.gmra.mxu1 %vm154_vm2, %v184_v40 }
 0x3f3   :  { %2637 = vmatprep.mubr.msk.f32.mxu1 %vm2944_vm1, %v2943_v15 }
 0x3f4   :  { %v421_v43 = vpop.permute.xlu0 %420 }
 0x3f5   :  { %2636 = vmatpush3.xpose.msk.msra.mxu1 %vm154_vm2, %v421_v43 }
 0x3f6   :  { %2645 = vmatprep.subr.mxu1 %v2943_v15 }
 0x3f8   :  { %v499_v46 = vpop.permute.xlu0 %498  ;;  %2638 = vmatmul.mubr.msk.f32.vlgmr.msra.gmra.mxu1 %vm154_vm2, %v185_v44 }
 0x3f9   :  { %2641 = vmatpush3.xpose.msk.msra.mxu0 %vm154_vm2, %v499_v46  ;;  %2647 = vmatprep.mubr.msk.f32.mxu1 %vm2944_vm1, %v2943_v15  ;;  %v2805_v46 = vld [vmem:[%s3481_s5 + $0x8] sm:$0xff]  }
 0x3fa   :  { %2650 = vmatprep.subr.mxu0 %v2943_v15 }
 0x3fc   :  { %2643 = vmatmul.mubr.msk.f32.vlgmr.msra.gmra.mxu0 %vm154_vm2, %v186_v47 }
 0x3fd   :  { %2652 = vmatprep.mubr.msk.f32.mxu0 %vm2944_vm1, %v2943_v15 }
 0x4ae   :  { %v337_v49 = vpop.f32.mrf.mxu1 }
 0x4af   :  { %v338_v50 = vadd.f32 %v3123_v48, %v337_v49 }
 0x4b0   :  { %v2629_v51 = vpop.f32.mrf.mxu1 }
 0x4b1   :  { %v576_v53 = vsel %vm575_vm3, %v338_v50, -inf  ;;  %v2806_v51 = vld [vmem:[%s3481_s5] sm:$0xff]  }
 0x4b2   :  { %577 = vmax.xlane.f32.xlu1 %v576_v53  ;;  %v415_v56 = vpop.f32.mrf.mxu1 }
 0x4b3   :  { %v416_v57 = vadd.f32 %v3129_v52, %v415_v56 }
 0x4b4   :  { %v2634_v58 = vpop.f32.mrf.mxu1 }
 0x4b5   :  { %v579_v59 = vsel %vm575_vm3, %v416_v57, -inf }
 0x4b6   :  { %580 = vmax.xlane.f32.xlu0 %v579_v59 }
 0x4b8   :  { %v493_v61 = vpop.f32.mrf.mxu1 }
 0x4b9   :  { %v494_v62 = vadd.f32 %v3137_v60, %v493_v61 }
 0x4ba   :  { %v2639_v63 = vpop.f32.mrf.mxu1 }
 0x4bb   :  { %v582_v3 = vsel %vm575_vm3, %v494_v62, -inf }
 0x4bc   :  { %583 = vmax.xlane.f32.xlu0 %v582_v3  ;;  %v571_v4 = vpop.f32.mrf.mxu0 }
 0x4bd   :  { %v572_v5 = vadd.f32 %v3143_v2, %v571_v4 }
 0x4be   :  { %v2644_v6 = vpop.f32.mrf.mxu0 }
 0x4bf   :  { %v585_v7 = vsel %vm575_vm3, %v572_v5, -inf }
 0x4c0   :  { %586 = vmax.xlane.f32.xlu0 %v585_v7 }
 0x4c3   :  { %620 = vrot.lane.b32.xlu1 %v3044_v31, %s2948_s15 }
 0x53b   :  { %v578_v8 = vpop.xlane.xlu1 %577 }
 0x53c   :  { %v588_v9 = vsub.f32 %v338_v50, %v578_v8 }
 0x53e   :  { %v592_v10 = vmul.f32 1.442695, %v588_v9 }
 0x53f   :  { %v621_v11 = vpop.permute.xlu1 %620  ;;  %v581_v12 = vpop.xlane.xlu0 %580 }
 0x540   :  { %2851 = vpow2.f32 %v592_v10  ;;  %v589_v13 = vsub.f32 %v416_v57, %v581_v12  ;;  %2646 = vmatpush3.msra.mxu1 %v621_v11 }
 0x541   :  { %2655 = vmatprep.subr.mxu1 %v2943_v15 }
 0x542   :  { %v594_v14 = vmul.f32 1.442695, %v589_v13 }
 0x544   :  { %2853 = vpow2.f32 %v594_v14 }
 0x545   :  { %v584_v16 = vpop.xlane.xlu0 %583 }
 0x546   :  { %v590_v17 = vsub.f32 %v494_v62, %v584_v16 }
 0x548   :  { %v596_v18 = vmul.f32 1.442695, %v590_v17 }
 0x549   :  { %v587_v19 = vpop.xlane.xlu0 %586 }
 0x54a   :  { %2855 = vpow2.f32 %v596_v18  ;;  %v591_v20 = vsub.f32 %v572_v5, %v587_v19 }
 0x54c   :  { %v598_v21 = vmul.f32 1.442695, %v591_v20 }
 0x54d   :  { %v2852_v31 = vpop.eup %2851 }
 0x54e   :  { %2857 = vpow2.f32 %v598_v21  ;;  %v600_v22 = vsel %vm575_vm3, %v2852_v31, 0.0 }
 0x54f   :  { %601 = vadd.xlane.f32.xlu1 %v600_v22 }
 0x551   :  { %v2854_v23 = vpop.eup %2853 }
 0x552   :  { %v603_v24 = vsel %vm575_vm3, %v2854_v23, 0.0 }
 0x553   :  { %604 = vadd.xlane.f32.xlu0 %v603_v24  ;;  %v2808_v24 = vld [vmem:[%s3483_s7] sm:$0xff]  }
 0x557   :  { %v2856_v25 = vpop.eup %2855 }
 0x558   :  { %v606_v27 = vsel %vm575_vm3, %v2856_v25, 0.0 }
 0x559   :  { %607 = vadd.xlane.f32.xlu1 %v606_v27 }
 0x55b   :  { %v2858_v28 = vpop.eup %2857 }
 0x55c   :  { %v609_v29 = vsel %vm575_vm3, %v2858_v28, 0.0 }
 0x55d   :  { %610 = vadd.xlane.f32.xlu0 %v609_v29 }
 0x56a   :  { %772 = vrot.lane.b32.xlu1 %v3058_v37, %s2948_s15 }
 0x56e   :  { %848 = vrot.lane.b32.xlu1 %v3063_v39, %s2948_s15 }
 0x573   :  { %696 = vrot.lane.b32.xlu0 %v3048_v33, %s2948_s15 }
 0x5d8   :  { %v602_v30 = vpop.xlane.xlu1 %601 }
 0x5d9   :  { %2859 = vrcp.f32 %v602_v30 }
 0x5dc   :  { %v605_v32 = vpop.xlane.xlu0 %604 }
 0x5dd   :  { %2861 = vrcp.f32 %v605_v32 }
 0x5e2   :  { %v608_v34 = vpop.xlane.xlu1 %607 }
 0x5e3   :  { %2863 = vrcp.f32 %v608_v34 }
 0x5e6   :  { %v2860_v35 = vpop.eup %2859  ;;  %v611_v36 = vpop.xlane.xlu0 %610 }
 0x5e7   :  { %v773_v38 = vpop.permute.xlu1 %772  ;;  %2865 = vrcp.f32 %v611_v36  ;;  %v616_v40 = vmul.f32 %v2860_v35, %v2852_v31 }
 0x5e9   :  { %2648 = vmatmul.mubr.msk.f32.vlgmr.msra.gmra.mxu1 %vm575_vm3, %v616_v40 }
 0x5ea   :  { %v2862_v37 = vpop.eup %2861  ;;  %2656 = vmatpush3.msra.mxu1 %v773_v38  ;;  %v697_v41 = vpop.permute.xlu0 %696  ;;  %2657 = vmatprep.mubr.msk.f32.mxu1 %vm2944_vm1, %v2943_v15  ;;  %v2474_v38 = vld [vmem:[%s3482_s6] ss:$0 sm:$0xff] }
 0x5eb   :  { %2651 = vmatpush3.msra.mxu0 %v697_v41  ;;  %v617_v33 = vmul.f32 %v2862_v37, %v2854_v23  ;;  %2681 = vmatprep.subr.bf16.mxu1 %v2943_v15  ;;  %v849_v39 = vpop.permute.xlu1 %848  ;;  %v2807_v23 = vld [vmem:[%s3483_s7 + $0x8] sm:$0xff]  }
 0x5ec   :  { %2660 = vmatprep.subr.mxu0 %v2943_v15 }
 0x5ed   :  { %2653 = vmatmul.mubr.msk.f32.vlgmr.msra.gmra.mxu0 %vm575_vm3, %v617_v33 }
 0x5ee   :  { %2661 = vmatpush3.msra.mxu0 %v849_v39  ;;  %2662 = vmatprep.mubr.msk.f32.mxu0 %vm2944_vm1, %v2943_v15  ;;  %v2809_v39 = vld [vmem:[%s3484_s8 + $0x38] sm:$0xff]  }
 0x5ef   :  { %2665 = vmatprep.subr.bf16.mxu0 %v2943_v15 }
 0x5f0   :  { %v2864_v42 = vpop.eup %2863 }
 0x5f1   :  { %v618_v43 = vmul.f32 %v2864_v42, %v2856_v25  ;;  %v2810_v42 = vld [vmem:[%s3484_s8 + $0x30] sm:$0xff]  }
 0x5f3   :  { %2658 = vmatmul.mubr.msk.f32.vlgmr.msra.gmra.mxu1 %vm575_vm3, %v618_v43 }
 0x5f4   :  { %v2866_v44 = vpop.eup %2865  ;;  %2697 = vmatprep.mubr.msk.bf16.mxu1 %vm2944_vm1, %v2943_v15  ;;  %2682 = vmatpush3.bf16.msra.mxu1 %v2809_v39 }
 0x5f5   :  { %v619_v45 = vmul.f32 %v2866_v44, %v2858_v28  ;;  %2683 = vmatprep.subr.bf16.mxu1 %v2943_v15 }
 0x5f7   :  { %2663 = vmatmul.mubr.msk.f32.vlgmr.msra.gmra.mxu0 %vm575_vm3, %v619_v45  ;;  %v2811_v45 = vld [vmem:[%s3484_s8 + $0x28] sm:$0xff]  }
 0x5f8   :  { %2669 = vmatprep.mubr.msk.bf16.mxu0 %vm2944_vm1, %v2943_v15  ;;  %2666 = vmatpush3.bf16.msra.mxu0 %v2805_v46 }
 0x5f9   :  { %2667 = vmatprep.subr.bf16.mxu0 %v2943_v15  ;;  %2684 = vmatpush3.bf16.msra.mxu1 %v2810_v42 }
 0x5fa   :  { %2685 = vmatprep.subr.bf16.mxu1 %v2943_v15 }
 0x5fc   :  { %2668 = vmatpush3.bf16.msra.mxu0 %v2806_v51  ;;  %v2814_v51 = vld [vmem:[%s3484_s8 + $0x10] sm:$0xff]  }
 0x5fd   :  { %2673 = vmatprep.subr.bf16.mxu0 %v2943_v15  ;;  %2686 = vmatpush3.bf16.msra.mxu1 %v2811_v45 }
 0x5fe   :  { %2687 = vmatprep.subr.bf16.mxu1 %v2943_v15 }
 0x6a9   :  { %v692_v47 = vpop.f32.mrf.mxu1 }
 0x6ab   :  { %v2649_v49 = vpop.f32.mrf.mxu1 }
 0x6ac   :  { %v2812_v49 = vld [vmem:[%s3484_s8 + $0x20] sm:$0xff]  }
 0x6ad   :  { %v768_v50 = vpop.f32.mrf.mxu0  ;;  %2688 = vmatpush3.bf16.msra.mxu1 %v2812_v49 }
 0x6ae   :  { %2689 = vmatprep.subr.bf16.mxu1 %v2943_v15 }
 0x6af   :  { %v2654_v53 = vpop.f32.mrf.mxu0 }
 0x6b0   :  { %v2815_v53 = vld [vmem:[%s3484_s8 + $0x8] sm:$0xff]  }
 0x6b3   :  { %v844_v56 = vpop.f32.mrf.mxu1 }
 0x6b5   :  { %v2659_v57 = vpop.f32.mrf.mxu1 }
 0x6b7   :  { %v920_v58 = vpop.f32.mrf.mxu0 }
 0x6b8   :  { %v2793_v59 = vpack.i.bf16 %v920_v58, %v844_v56  ;;  %v2816_v56 = vld [vmem:[%s3484_s8] sm:$0xff]  }
 0x6b9   :  { %v2664_v61 = vpop.f32.mrf.mxu0 }
 0x6ba   :  { %2794 = vrot.lane.b32.xlu1 %v2793_v59, %s2949_s18 }
 0x72c   :  { %v2795_v62 = vpop.permute.xlu1 %2794 }
 0x72d   :  { %v2797_v63 = vunpack.i.h.bf16 %v2795_v62  ;;  %v2796_v3 = vunpack.i.l.bf16 %v2795_v62 }
 0x72f   :  { %v933_v4 = vsel %vm154_vm2, %v768_v50, %v2797_v63  ;;  %v932_v5 = vsel %vm154_vm2, %v692_v47, %v2796_v3  ;;  %v2813_v50 = vld [vmem:[%s3484_s8 + $0x18] sm:$0xff]  }
 0x730   :  { %v934_v6 = vpack.c.bf16 %v933_v4, %v932_v5  ;;  %2690 = vmatpush3.bf16.msra.mxu1 %v2813_v50  ;;  %v2487_v50 = vld [vmem:[%s3478_s2 + $0x1] ss:$0 sm:$0xff] }
 0x731   :  { %2691 = vmatprep.subr.bf16.mxu1 %v2943_v15 }
 0x732   :  { %2670 = vmatmul.mubr.msk.bf16.vlgmr.msra.gmra.mxu0 %vm44_vm0, %v934_v6 }
 0x733   :  { %2677 = vmatprep.mubr.msk.bf16.mxu0 %vm2944_vm1, %v2943_v15  ;;  %2674 = vmatpush3.bf16.msra.mxu0 %v2807_v23 }
 0x734   :  { %2675 = vmatprep.subr.bf16.mxu0 %v2943_v15  ;;  %2692 = vmatpush3.bf16.msra.mxu1 %v2814_v51 }
 0x735   :  { %2693 = vmatprep.subr.bf16.mxu1 %v2943_v15 }
 0x737   :  { %2676 = vmatpush3.bf16.msra.mxu0 %v2808_v24 }
 0x738   :  { %2701 = vmatprep.subr.bf16.mxu0 %v2943_v15  ;;  %2694 = vmatpush3.bf16.msra.mxu1 %v2815_v53 }
 0x739   :  { %2695 = vmatprep.subr.bf16.mxu1 %v2943_v15 }
 0x73c   :  { %2696 = vmatpush3.bf16.msra.mxu1 %v2816_v56 }
 0x73d   :  { %2749 = vmatprep.subr.bf16.mxu1 %v2943_v15 }
 0x7f2   :  { %v988_v7 = vpop.f32.mrf.mxu0 }
 0x7f3   :  { %v3191_v8 = vadd.f32 %v988_v7, %v3009_v0 }
 0x7f4   :  { %v2671_v9 = vpop.f32.mrf.mxu0 }
 0x7f5   :  { %v998_v10 = vsel %vm44_vm0, %v3191_v8, 0.0 }
 0x7f6   :  { %999 = vadd.xlane.f32.xlu0 %v998_v10  ;;  %v991_v11 = vpop.f32.mrf.mxu0 }
 0x7f7   :  { %v3196_v12 = vadd.f32 %v991_v11, %v3014_v1 }
 0x7f8   :  { %v2672_v13 = vpop.f32.mrf.mxu0 }
 0x7f9   :  { %v1001_v14 = vsel %vm44_vm0, %v3196_v12, 0.0 }
 0x7fa   :  { %1002 = vadd.xlane.f32.xlu1 %v1001_v14 }
 0x87f   :  { %v1000_v16 = vpop.xlane.xlu0 %999 }
 0x880   :  { %v1004_v17 = vmul.f32 0.03125, %v1000_v16 }
 0x882   :  { %v1006_v18 = vsub.f32 %v3191_v8, %v1004_v17 }
 0x883   :  { %v1003_v0 = vpop.xlane.xlu1 %1002 }
 0x884   :  { %v1005_v19 = vmul.f32 0.03125, %v1003_v0  ;;  %v1008_v20 = vmul.f32 %v1006_v18, %v1006_v18 }
 0x886   :  { %v1007_v21 = vsub.f32 %v3196_v12, %v1005_v19  ;;  %v1010_v31 = vsel %vm44_vm0, %v1008_v20, 0.0 }
 0x887   :  { %1011 = vadd.xlane.f32.xlu0 %v1010_v31 }
 0x888   :  { %v1009_v22 = vmul.f32 %v1007_v21, %v1007_v21 }
 0x88a   :  { %v1013_v1 = vsel %vm44_vm0, %v1009_v22, 0.0 }
 0x88b   :  { %1014 = vadd.xlane.f32.xlu0 %v1013_v1 }
 0x910   :  { %v1012_v25 = vpop.xlane.xlu0 %1011 }
 0x911   :  { %v1016_v27 = vmul.f32 0.03125, %v1012_v25 }
 0x913   :  { %v1018_v28 = vadd.f32 1e-05, %v1016_v27 }
 0x914   :  { %v1015_v29 = vpop.xlane.xlu0 %1014 }
 0x915   :  { %2867 = vrsqrt.f32 %v1018_v28  ;;  %v1017_v30 = vmul.f32 0.03125, %v1015_v29 }
 0x917   :  { %v1019_v32 = vadd.f32 1e-05, %v1017_v30 }
 0x919   :  { %2869 = vrsqrt.f32 %v1019_v32 }
 0x922   :  { %v2868_v34 = vpop.eup %2867 }
 0x923   :  { %v1022_v35 = vmul.f32 %v2868_v34, %v1006_v18 }
 0x925   :  { %v1030_v37 = vmul.f32 %v2474_v38, %v1022_v35 }
 0x926   :  { %v2870_v36 = vpop.eup %2869 }
 0x927   :  { %v1023_v40 = vmul.f32 %v2870_v36, %v1007_v21 }
 0x929   :  { %v1031_v41 = vmul.f32 %v2474_v38, %v1023_v40 }
 0x92b   :  { %v1032_v33 = vpack.c.bf16 %v1031_v41, %v1030_v37  ;;  %v2817_v37 = vld [vmem:[%s3479_s3 + $0x18] sm:$0xff]   ;;  %v2818_v41 = vld [vmem:[%s3479_s3 + $0x10] sm:$0xff]   ;;  %s2950_s3 = smov [#allocation2]  }
 0x92d   :  { %2678 = vmatmul.mubr.msk.bf16.vlgmr.msra.gmra.mxu0 %vm44_vm0, %v1032_v33 }
 0x92e   :  { %2705 = vmatprep.mubr.msk.bf16.mxu0 %vm2944_vm1, %v2943_v15  ;;  %2702 = vmatpush3.bf16.msra.mxu0 %v2817_v37 }
 0x92f   :  { %2703 = vmatprep.subr.bf16.mxu0 %v2943_v15 }
 0x932   :  { %2704 = vmatpush3.bf16.msra.mxu0 %v2818_v41 }
 0x933   :  { %2709 = vmatprep.subr.mxu0 %v2943_v15 }
 0x9ed   :  { %v1086_v43 = vpop.f32.mrf.mxu0 }
 0x9ee   :  { %1093 = vrot.lane.b32.xlu0 %v1086_v43, %s2948_s15 }
 0x9ef   :  { %v2679_v44 = vpop.f32.mrf.mxu0 }
 0x9f1   :  { %v1089_v46 = vpop.f32.mrf.mxu0 }
 0x9f2   :  { %1095 = vrot.lane.b32.xlu1 %v1089_v46, %s2948_s15 }
 0x9f3   :  { %v2680_v47 = vpop.f32.mrf.mxu0 }
 0xa60   :  { %v1094_v57 = vpop.permute.xlu0 %1093 }
 0xa61   :  { %v1097_v58 = vmul.f32 %v1094_v57, %v1094_v57 }
 0xa63   :  { %v1099_v59 = vmul.f32 %v1097_v58, %v1094_v57 }
 0xa64   :  { %v1096_v61 = vpop.permute.xlu1 %1095 }
 0xa65   :  { %v1101_v62 = vmul.f32 0.044715, %v1099_v59  ;;  %v1098_v63 = vmul.f32 %v1096_v61, %v1096_v61 }
 0xa67   :  { %v1103_v3 = vadd.f32 %v1101_v62, %v1094_v57  ;;  %v1100_v4 = vmul.f32 %v1098_v63, %v1096_v61 }
 0xa69   :  { %v1105_v5 = vmul.f32 0.7978846, %v1103_v3  ;;  %v1102_v6 = vmul.f32 0.044715, %v1100_v4 }
 0xa6b   :  { %2871 = vtanh.f32 %v1105_v5  ;;  %v1104_v7 = vadd.f32 %v1102_v6, %v1096_v61 }
 0xa6d   :  { %v1106_v9 = vmul.f32 0.7978846, %v1104_v7 }
 0xa6f   :  { %2873 = vtanh.f32 %v1106_v9 }
 0xa78   :  { %v2872_v10 = vpop.eup %2871 }
 0xa79   :  { %v1109_v11 = vadd.f32 1.0, %v2872_v10 }
 0xa7b   :  { %v1111_v13 = vmul.f32 0.5, %v1109_v11 }
 0xa7c   :  { %v2874_v14 = vpop.eup %2873 }
 0xa7d   :  { %v1110_v16 = vadd.f32 1.0, %v2874_v14  ;;  %v1113_v17 = vmul.f32 %v1111_v13, %v1094_v57 }
 0xa7f   :  { %v1112_v18 = vmul.f32 0.5, %v1110_v16  ;;  %v1115_v19 = vmul.f32 %v1113_v17, %v1086_v43 }
 0xa81   :  { %v1114_v0 = vmul.f32 %v1112_v18, %v1096_v61 }
 0xa83   :  { %v1116_v20 = vmul.f32 %v1114_v0, %v1089_v46 }
 0xa85   :  { %v1117_v21 = vpack.c.bf16 %v1116_v20, %v1115_v19 }
 0xa87   :  { %2698 = vmatmul.mubr.bf16.vlgmr.msra.gmra.mxu1 %v1117_v21 }
 0xa88   :  { %2753 = vmatprep.mubr.msk.bf16.mxu1 %vm2944_vm1, %v2943_v15 }
 0xb47   :  { %v1216_v31 = vpop.f32.mrf.mxu1 }
 0xb48   :  { %v3255_v22 = vadd.f32 %v1216_v31, %v3191_v8  ;;  %v2495_v31 = vld [vmem:[%s3480_s4 + $0x2] sm:$0x3]  ;;  %s2443_s4 = sshll.u32 %s2950_s3, 4  ;;  %s2444_s4 = int_to_ptr.vmem [resolvable:$true] %s2443_s4 }
 0xb49   :  { %v2699_v1 = vpop.f32.mrf.mxu1  ;;  %p2926_p1 = scmp.lt.s32.totalorder %s2444_s4, %s2444_s4 }
 0xb4a   :  { %v1227_v23 = vsel %vm44_vm0, %v3255_v22, 0.0  ;;  %v1412_v1 = vrot.slane %v2495_v31, %v229_v55 }
 0xb4b   :  { %1228 = vadd.xlane.f32.xlu1 %v1227_v23  ;;  %v1219_v24 = vpop.f32.mrf.mxu1 }
 0xb4c   :  { %v3260_v25 = vadd.f32 %v1219_v24, %v3196_v12 }
 0xb4d   :  { %v2700_v27 = vpop.f32.mrf.mxu1 }
 0xb4e   :  { %v1230_v28 = vsel %vm44_vm0, %v3260_v25, 0.0 }
 0xb4f   :  { %1231 = vadd.xlane.f32.xlu0 %v1230_v28 }
 0xbd4   :  { %v1229_v29 = vpop.xlane.xlu1 %1228 }
 0xbd5   :  { %v1233_v30 = vmul.f32 0.03125, %v1229_v29 }
 0xbd7   :  { %v1235_v32 = vsub.f32 %v3255_v22, %v1233_v30 }
 0xbd8   :  { %v1232_v8 = vpop.xlane.xlu0 %1231 }
 0xbd9   :  { %v1234_v34 = vmul.f32 0.03125, %v1232_v8  ;;  %v1237_v35 = vmul.f32 %v1235_v32, %v1235_v32 }
 0xbdb   :  { %v1236_v36 = vsub.f32 %v3260_v25, %v1234_v34  ;;  %v1239_v38 = vsel %vm44_vm0, %v1237_v35, 0.0 }
 0xbdc   :  { %1240 = vadd.xlane.f32.xlu0 %v1239_v38 }
 0xbdd   :  { %v1238_v40 = vmul.f32 %v1236_v36, %v1236_v36 }
 0xbdf   :  { %v1242_v12 = vsel %vm44_vm0, %v1238_v40, 0.0 }
 0xbe0   :  { %1243 = vadd.xlane.f32.xlu1 %v1242_v12 }
 0xc65   :  { %v1241_v33 = vpop.xlane.xlu0 %1240 }
 0xc66   :  { %v1245_v39 = vmul.f32 0.03125, %v1241_v33 }
 0xc68   :  { %v1247_v42 = vadd.f32 1e-05, %v1245_v39 }
 0xc69   :  { %v1244_v43 = vpop.xlane.xlu1 %1243 }
 0xc6a   :  { %2875 = vrsqrt.f32 %v1247_v42  ;;  %v1246_v44 = vmul.f32 0.03125, %v1244_v43 }
 0xc6c   :  { %v1248_v45 = vadd.f32 1e-05, %v1246_v44 }
 0xc6e   :  { %2877 = vrsqrt.f32 %v1248_v45 }
 0xc77   :  { %v2876_v46 = vpop.eup %2875 }
 0xc78   :  { %v1251_v47 = vmul.f32 %v2876_v46, %v1235_v32 }
 0xc7a   :  { %v1259_v53 = vmul.f32 %v2487_v50, %v1251_v47 }
 0xc7b   :  { %v2878_v49 = vpop.eup %2877 }
 0xc7c   :  { %v1252_v51 = vmul.f32 %v2878_v49, %v1236_v36 }
 0xc7e   :  { %v1260_v56 = vmul.f32 %v2487_v50, %v1252_v51 }
 0xc80   :  { %v1261_v57 = vpack.c.bf16 %v1260_v56, %v1259_v53 }
 0xc82   :  { %2706 = vmatmul.mubr.msk.bf16.vlgmr.msra.gmra.mxu0 %vm44_vm0, %v1261_v57  ;;  %v1364_v57 = vrot.slane %v2495_v31, %v181_v26 }
 0xc83   :  { %2711 = vmatprep.mubr.msk.f32.mxu0 %vm2944_vm1, %v2943_v15 }
 0xd42   :  { %v3282_v58 = vpop.f32.mrf.mxu0 }
 0xd43   :  { %1327 = vrot.lane.b32.xlu0 %v3282_v58, %s2945_s22  ;;  %v1333_v63 = vmul.f32 %v3282_v58, %v3282_v58 }
 0xd44   :  { %v2707_v59 = vpop.f32.mrf.mxu0 }
 0xd45   :  { %v1337_v14 = vsel %vm154_vm2, %v1333_v63, 0.0 }
 0xd46   :  { %v3286_v61 = vpop.f32.mrf.mxu0 }
 0xd47   :  { %1329 = vrot.lane.b32.xlu1 %v3286_v61, %s2945_s22  ;;  %v1334_v3 = vmul.f32 %v3286_v61, %v3286_v61  ;;  %s2921_s22 = scalar_lea.vmem %s2444_s4, 32 }
 0xd48   :  { %v2708_v62 = vpop.f32.mrf.mxu0  ;;  %p2922_p0 = scmp.ne.s32.totalorder %s2444_s4, %s2921_s22  ;;  %p2927_p2 = scmp.lt.s32.totalorder %s2921_s22, %s2921_s22 }
 0xd49   :  { %v1340_v16 = vsel %vm154_vm2, %v1334_v3, 0.0 }
 0xd4a   :  { %p2928_p3 = por %p2927_p2, %p2926_p1 }
 0xd4b   :  { %1373 = vrot.lane.b32.xlu1 %v1333_v63, %s2946_s23 }
 0xd4c   :  { %p2929_p4 = pnand %p2928_p3, %p2922_p0 }
 0xd4f   :  { %1375 = vrot.lane.b32.xlu1 %v1334_v3, %s2946_s23 }
 0xdb5   :  { %v3296_v4 = vpop.permute.xlu0 %1327 }
 0xdb6   :  { %v1335_v5 = vmul.f32 %v3296_v4, %v3296_v4 }
 0xdb8   :  { %1377 = vrot.lane.b32.xlu0 %v1335_v5, %s2946_s23  ;;  %v1343_v17 = vsel %vm154_vm2, %v1335_v5, 0.0 }
 0xdb9   :  { %v3301_v6 = vpop.permute.xlu1 %1329 }
 0xdba   :  { %v1336_v7 = vmul.f32 %v3301_v6, %v3301_v6 }
 0xdbc   :  { %1379 = vrot.lane.b32.xlu1 %v1336_v7, %s2946_s23  ;;  %v1346_v18 = vsel %vm154_vm2, %v1336_v7, 0.0 }
 0xdbd   :  { %v1374_v9 = vpop.permute.xlu1 %1373 }
 0xdbe   :  { %v1385_v10 = vsel %vm154_vm2, %v1374_v9, 0.0 }
 0xdc1   :  { %v1376_v11 = vpop.permute.xlu1 %1375 }
 0xdc2   :  { %v1388_v13 = vsel %vm154_vm2, %v1376_v11, 0.0 }
 0xdd7   :  { %1386 = vadd.xlane.f32.xlu0 %v1385_v10 }
 0xde0   :  { %1389 = vadd.xlane.f32.xlu1 %v1388_v13 }
 0xde4   :  { %1338 = vadd.xlane.f32.xlu1 %v1337_v14 }
 0xde8   :  { %1341 = vadd.xlane.f32.xlu1 %v1340_v16 }
 0xdec   :  { %1344 = vadd.xlane.f32.xlu1 %v1343_v17 }
 0xdf0   :  { %1347 = vadd.xlane.f32.xlu1 %v1346_v18 }
 0xe2a   :  { %v1378_v0 = vpop.permute.xlu0 %1377 }
 0xe2b   :  { %v1391_v19 = vsel %vm154_vm2, %v1378_v0, 0.0 }
 0xe2c   :  { %1392 = vadd.xlane.f32.xlu0 %v1391_v19 }
 0xe2e   :  { %v1380_v20 = vpop.permute.xlu1 %1379 }
 0xe2f   :  { %v1394_v21 = vsel %vm154_vm2, %v1380_v20, 0.0 }
 0xe30   :  { %1395 = vadd.xlane.f32.xlu0 %v1394_v21 }
 0xe46   :  { %1414 = vrot.lane.b32.xlu0 %v1412_v1, %s2947_s26 }
 0xe60   :  { %v1387_v23 = vpop.xlane.xlu0 %1386 }
 0xe61   :  { %v1397_v27 = vadd.f32 1e-12, %v1387_v23 }
 0xe63   :  { %2879 = vrsqrt.f32 %v1397_v27 }
 0xe69   :  { %v1390_v24 = vpop.xlane.xlu1 %1389 }
 0xe6a   :  { %v1398_v28 = vadd.f32 1e-12, %v1390_v24 }
 0xe6c   :  { %2881 = vrsqrt.f32 %v1398_v28 }
 0xe6d   :  { %v1339_v44 = vpop.xlane.xlu1 %1338 }
 0xe6e   :  { %v1349_v46 = vadd.f32 1e-12, %v1339_v44 }
 0xe70   :  { %v2880_v32 = vpop.eup %2879 }
 0xe71   :  { %v1405_v55 = vmul.f32 %v2880_v32, %v3282_v58  ;;  %v1342_v45 = vpop.xlane.xlu1 %1341 }
 0xe72   :  { %v1350_v47 = vadd.f32 1e-12, %v1342_v45 }
 0xe75   :  { %v1345_v49 = vpop.xlane.xlu1 %1344 }
 0xe76   :  { %v1351_v50 = vadd.f32 1e-12, %v1345_v49 }
 0xe79   :  { %v2882_v8 = vpop.eup %2881  ;;  %v1348_v51 = vpop.xlane.xlu1 %1347 }
 0xe7a   :  { %v1406_v36 = vmul.f32 %v2882_v8, %v3286_v61  ;;  %v1352_v53 = vadd.f32 1e-12, %v1348_v51 }
 0xeb5   :  { %v1393_v29 = vpop.xlane.xlu0 %1392 }
 0xeb6   :  { %v1399_v30 = vadd.f32 1e-12, %v1393_v29 }
 0xeb8   :  { %2883 = vrsqrt.f32 %v1399_v30 }
 0xeb9   :  { %v1396_v34 = vpop.xlane.xlu0 %1395 }
 0xeba   :  { %v1400_v35 = vadd.f32 1e-12, %v1396_v34 }
 0xebc   :  { %2885 = vrsqrt.f32 %v1400_v35 }
 0xebd   :  { %v1415_v38 = vpop.permute.xlu0 %1414  ;;  %2887 = vrsqrt.f32 %v1349_v46 }
 0xebe   :  { %v1418_v40 = vmul.f32 %v1415_v38, %v1406_v36  ;;  %v1417_v12 = vmul.f32 %v1415_v38, %v1405_v55  ;;  %2889 = vrsqrt.f32 %v1350_v47 }
 0xebf   :  { %2891 = vrsqrt.f32 %v1351_v50 }
 0xec0   :  { %1500 = vrot.lane.b32.xlu0 %v1418_v40, %s2946_s23  ;;  %1422 = vrot.lane.b32.xlu1 %v1417_v12, %s2946_s23  ;;  %2893 = vrsqrt.f32 %v1352_v53 }
 0xec5   :  { %v2884_v37 = vpop.eup %2883 }
 0xec6   :  { %v1407_v41 = vmul.f32 %v2884_v37, %v3296_v4 }
 0xec8   :  { %v1419_v33 = vmul.f32 %v1415_v38, %v1407_v41 }
 0xec9   :  { %v2886_v39 = vpop.eup %2885 }
 0xeca   :  { %1578 = vrot.lane.b32.xlu0 %v1419_v33, %s2946_s23  ;;  %v1408_v42 = vmul.f32 %v2886_v39, %v3301_v6  ;;  %v2888_v56 = vpop.eup %2887 }
 0xecb   :  { %v1357_v59 = vmul.f32 %v2888_v56, %v3282_v58  ;;  %v2890_v62 = vpop.eup %2889 }
 0xecc   :  { %v1420_v43 = vmul.f32 %v1415_v38, %v1408_v42  ;;  %v1358_v5 = vmul.f32 %v2890_v62, %v3286_v61  ;;  %v2892_v9 = vpop.eup %2891 }
 0xecd   :  { %v1365_v3 = vmul.f32 %v1364_v57, %v1357_v59  ;;  %v1359_v26 = vmul.f32 %v2892_v9, %v3296_v4  ;;  %v2894_v10 = vpop.eup %2893  ;;  %v2819_v9 = vld [vmem:[%s3481_s5 + $0x18] sm:$0xff]  }
 0xece   :  { %1656 = vrot.lane.b32.xlu0 %v1420_v43, %s2946_s23  ;;  %v1366_v54 = vmul.f32 %v1364_v57, %v1358_v5  ;;  %v1360_v14 = vmul.f32 %v2894_v10, %v3301_v6  ;;  %2750 = vmatpush3.bf16.msra.mxu1 %v2819_v9 }
 0xecf   :  { %v1367_v13 = vmul.f32 %v1364_v57, %v1359_v26  ;;  %2751 = vmatprep.subr.bf16.mxu1 %v2943_v15 }
 0xed0   :  { %v1368_v17 = vmul.f32 %v1364_v57, %v1360_v14 }
 0xf32   :  { %v1423_v63 = vpop.permute.xlu1 %1422  ;;  %v1501_v7 = vpop.permute.xlu0 %1500 }
 0xf33   :  { %2710 = vmatpush3.xpose.msk.msra.mxu0 %vm154_vm2, %v1423_v63 }
 0xf34   :  { %2714 = vmatprep.subr.mxu0 %v2943_v15 }
 0xf36   :  { %2712 = vmatmul.mubr.msk.f32.vlgmr.msra.gmra.mxu0 %vm154_vm2, %v1365_v3 }
 0xf37   :  { %2715 = vmatpush3.xpose.msk.msra.mxu0 %vm154_vm2, %v1501_v7  ;;  %2716 = vmatprep.mubr.msk.f32.mxu0 %vm2944_vm1, %v2943_v15 }
 0xf38   :  { %2719 = vmatprep.subr.mxu0 %v2943_v15 }
 0xf3a   :  { %2717 = vmatmul.mubr.msk.f32.vlgmr.msra.gmra.mxu0 %vm154_vm2, %v1366_v54 }
 0xf3b   :  { %2721 = vmatprep.mubr.msk.f32.mxu0 %vm2944_vm1, %v2943_v15 }
 0xf3c   :  { %v1579_v11 = vpop.permute.xlu0 %1578 }
 0xf3d   :  { %2720 = vmatpush3.xpose.msk.msra.mxu0 %vm154_vm2, %v1579_v11  ;;  %v2820_v11 = vld [vmem:[%s3481_s5 + $0x10] sm:$0xff]  }
 0xf3e   :  { %2724 = vmatprep.subr.mxu0 %v2943_v15  ;;  %2752 = vmatpush3.bf16.msra.mxu1 %v2820_v11 }
 0xf3f   :  { %2765 = vmatprep.subr.bf16.mxu1 %v2943_v15 }
 0xf40   :  { %v1657_v16 = vpop.permute.xlu0 %1656  ;;  %2722 = vmatmul.mubr.msk.f32.vlgmr.msra.gmra.mxu0 %vm154_vm2, %v1367_v13 }
 0xf41   :  { %2725 = vmatpush3.xpose.msk.msra.mxu0 %vm154_vm2, %v1657_v16  ;;  %2726 = vmatprep.mubr.msk.f32.mxu0 %vm2944_vm1, %v2943_v15 }
 0xf42   :  { %2729 = vmatprep.subr.mxu0 %v2943_v15 }
 0xf44   :  { %2727 = vmatmul.mubr.msk.f32.vlgmr.msra.gmra.mxu0 %vm154_vm2, %v1368_v17 }
 0xf45   :  { %2731 = vmatprep.mubr.msk.f32.mxu0 %vm2944_vm1, %v2943_v15 }
 0xff6   :  { %v1495_v18 = vpop.f32.mrf.mxu0 }
 0xff7   :  { %v1496_v0 = vadd.f32 %v3123_v48, %v1495_v18 }
 0xff8   :  { %v2713_v19 = vpop.f32.mrf.mxu0 }
 0xff9   :  { %v1733_v20 = vsel %vm575_vm3, %v1496_v0, -inf }
 0xffa   :  { %1734 = vmax.xlane.f32.xlu1 %v1733_v20  ;;  %v1573_v21 = vpop.f32.mrf.mxu0 }
 0xffb   :  { %v1574_v31 = vadd.f32 %v3129_v52, %v1573_v21 }
 0xffc   :  { %v2718_v1 = vpop.f32.mrf.mxu0 }
 0xffd   :  { %v1736_v23 = vsel %vm575_vm3, %v1574_v31, -inf }
 0xffe   :  { %1737 = vmax.xlane.f32.xlu0 %v1736_v23 }
0x1000   :  { %v1651_v24 = vpop.f32.mrf.mxu0 }
0x1001   :  { %v1652_v27 = vadd.f32 %v3137_v60, %v1651_v24 }
0x1002   :  { %v2723_v28 = vpop.f32.mrf.mxu0 }
0x1003   :  { %v1739_v29 = vsel %vm575_vm3, %v1652_v27, -inf }
0x1004   :  { %1740 = vmax.xlane.f32.xlu0 %v1739_v29  ;;  %v1729_v30 = vpop.f32.mrf.mxu0 }
0x1005   :  { %v1730_v48 = vadd.f32 %v3143_v2, %v1729_v30 }
0x1006   :  { %v2728_v32 = vpop.f32.mrf.mxu0 }
0x1007   :  { %v1742_v8 = vsel %vm575_vm3, %v1730_v48, -inf }
0x1008   :  { %1743 = vmax.xlane.f32.xlu0 %v1742_v8 }
0x100b   :  { %1777 = vrot.lane.b32.xlu1 %v3282_v58, %s2948_s15 }
0x1083   :  { %v1735_v52 = vpop.xlane.xlu1 %1734 }
0x1084   :  { %v1745_v34 = vsub.f32 %v1496_v0, %v1735_v52 }
0x1086   :  { %v1749_v35 = vmul.f32 1.442695, %v1745_v34 }
0x1087   :  { %v1778_v36 = vpop.permute.xlu1 %1777  ;;  %v1738_v55 = vpop.xlane.xlu0 %1737 }
0x1088   :  { %2895 = vpow2.f32 %v1749_v35  ;;  %v1746_v60 = vsub.f32 %v1574_v31, %v1738_v55  ;;  %2730 = vmatpush3.msra.mxu0 %v1778_v36 }
0x1089   :  { %2734 = vmatprep.subr.mxu0 %v2943_v15 }
0x108a   :  { %v1751_v38 = vmul.f32 1.442695, %v1746_v60 }
0x108c   :  { %2897 = vpow2.f32 %v1751_v38 }
0x108d   :  { %v1741_v2 = vpop.xlane.xlu0 %1740 }
0x108e   :  { %v1747_v40 = vsub.f32 %v1652_v27, %v1741_v2 }
0x1090   :  { %v1753_v12 = vmul.f32 1.442695, %v1747_v40  ;;  %v2821_v40 = vld [vmem:[%s3483_s7 + $0x18] sm:$0xff]  }
0x1091   :  { %v1744_v37 = vpop.xlane.xlu0 %1743 }
0x1092   :  { %2899 = vpow2.f32 %v1753_v12  ;;  %v1748_v41 = vsub.f32 %v1730_v48, %v1744_v37  ;;  %v2822_v12 = vld [vmem:[%s3483_s7 + $0x10] sm:$0xff]  }
0x1094   :  { %v1755_v33 = vmul.f32 1.442695, %v1748_v41 }
0x1095   :  { %v2896_v58 = vpop.eup %2895 }
0x1096   :  { %2901 = vpow2.f32 %v1755_v33  ;;  %v1757_v39 = vsel %vm575_vm3, %v2896_v58, 0.0 }
0x1097   :  { %1758 = vadd.xlane.f32.xlu1 %v1757_v39 }
0x1099   :  { %v2898_v42 = vpop.eup %2897 }
0x109a   :  { %v1760_v43 = vsel %vm575_vm3, %v2898_v42, 0.0 }
0x109b   :  { %1761 = vadd.xlane.f32.xlu0 %v1760_v43 }
0x109f   :  { %v2900_v44 = vpop.eup %2899 }
0x10a0   :  { %v1763_v45 = vsel %vm575_vm3, %v2900_v44, 0.0 }
0x10a1   :  { %1764 = vadd.xlane.f32.xlu1 %v1763_v45 }
0x10a3   :  { %v2902_v46 = vpop.eup %2901 }
0x10a4   :  { %v1766_v47 = vsel %vm575_vm3, %v2902_v46, 0.0 }
0x10a5   :  { %1767 = vadd.xlane.f32.xlu0 %v1766_v47 }
0x10b2   :  { %1929 = vrot.lane.b32.xlu1 %v3296_v4, %s2948_s15 }
0x10b6   :  { %2005 = vrot.lane.b32.xlu1 %v3301_v6, %s2948_s15 }
0x10bb   :  { %1853 = vrot.lane.b32.xlu0 %v3286_v61, %s2948_s15 }
0x1120   :  { %v1759_v49 = vpop.xlane.xlu1 %1758 }
0x1121   :  { %2903 = vrcp.f32 %v1759_v49 }
0x1124   :  { %v1762_v50 = vpop.xlane.xlu0 %1761 }
0x1125   :  { %2905 = vrcp.f32 %v1762_v50 }
0x112a   :  { %v1765_v51 = vpop.xlane.xlu1 %1764 }
0x112b   :  { %2907 = vrcp.f32 %v1765_v51 }
0x112e   :  { %v2904_v53 = vpop.eup %2903  ;;  %v1768_v56 = vpop.xlane.xlu0 %1767 }
0x112f   :  { %2909 = vrcp.f32 %v1768_v56  ;;  %v1773_v57 = vmul.f32 %v2904_v53, %v2896_v58  ;;  %v1930_v61 = vpop.permute.xlu1 %1929  ;;  %v2823_v53 = vld [vmem:[%s3484_s8 + $0x78] sm:$0xff]   ;;  %v2824_v56 = vld [vmem:[%s3484_s8 + $0x70] sm:$0xff]  }
0x1131   :  { %2732 = vmatmul.mubr.msk.f32.vlgmr.msra.gmra.mxu0 %vm575_vm3, %v1773_v57 }
0x1132   :  { %v2906_v59 = vpop.eup %2905  ;;  %v1854_v4 = vpop.permute.xlu0 %1853  ;;  %2736 = vmatprep.mubr.msk.f32.mxu0 %vm2944_vm1, %v2943_v15 }
0x1133   :  { %2735 = vmatpush3.msra.mxu0 %v1854_v4  ;;  %v1774_v6 = vmul.f32 %v2906_v59, %v2898_v42  ;;  %v2006_v3 = vpop.permute.xlu1 %2005  ;;  %v2825_v4 = vld [vmem:[%s3484_s8 + $0x68] sm:$0xff]  }
0x1134   :  { %2739 = vmatprep.subr.mxu0 %v2943_v15 }
0x1135   :  { %2737 = vmatmul.mubr.msk.f32.vlgmr.msra.gmra.mxu0 %vm575_vm3, %v1774_v6 }
0x1136   :  { %2740 = vmatpush3.msra.mxu0 %v1930_v61  ;;  %2741 = vmatprep.mubr.msk.f32.mxu0 %vm2944_vm1, %v2943_v15 }
0x1137   :  { %2744 = vmatprep.subr.mxu0 %v2943_v15 }
0x1138   :  { %v2908_v62 = vpop.eup %2907 }
0x1139   :  { %v1775_v63 = vmul.f32 %v2908_v62, %v2900_v44  ;;  %v2826_v62 = vld [vmem:[%s3484_s8 + $0x60] sm:$0xff]  }
0x113b   :  { %2742 = vmatmul.mubr.msk.f32.vlgmr.msra.gmra.mxu0 %vm575_vm3, %v1775_v63  ;;  %v2827_v63 = vld [vmem:[%s3484_s8 + $0x58] sm:$0xff]  }
0x113c   :  { %v2910_v5 = vpop.eup %2909  ;;  %2745 = vmatpush3.msra.mxu0 %v2006_v3  ;;  %2746 = vmatprep.mubr.msk.f32.mxu0 %vm2944_vm1, %v2943_v15  ;;  %v2828_v3 = vld [vmem:[%s3484_s8 + $0x50] sm:$0xff]  }
0x113d   :  { %v1776_v7 = vmul.f32 %v2910_v5, %v2902_v46  ;;  %2757 = vmatprep.subr.bf16.mxu0 %v2943_v15  ;;  %v2516_v46 = vld [vmem:[%s3482_s6 + $0x1] ss:$0 sm:$0xff]  ;;  %v2829_v5 = vld [vmem:[%s3484_s8 + $0x48] sm:$0xff]  }
0x113f   :  { %2747 = vmatmul.mubr.msk.f32.vlgmr.msra.gmra.mxu0 %vm575_vm3, %v1776_v7  ;;  %v2830_v7 = vld [vmem:[%s3484_s8 + $0x40] sm:$0xff]  }
0x1140   :  { %2761 = vmatprep.mubr.msk.bf16.mxu0 %vm2944_vm1, %v2943_v15  ;;  %2758 = vmatpush3.bf16.msra.mxu0 %v2821_v40 }
0x1141   :  { %2759 = vmatprep.subr.bf16.mxu0 %v2943_v15 }
0x1144   :  { %2760 = vmatpush3.bf16.msra.mxu0 %v2822_v12 }
0x11f1   :  { %v1849_v54 = vpop.f32.mrf.mxu0 }
0x11f3   :  { %v2733_v26 = vpop.f32.mrf.mxu0 }
0x11f5   :  { %v1925_v10 = vpop.f32.mrf.mxu0 }
0x11f7   :  { %v2738_v13 = vpop.f32.mrf.mxu0 }
0x11fb   :  { %v2001_v14 = vpop.f32.mrf.mxu0 }
0x11fd   :  { %v2743_v16 = vpop.f32.mrf.mxu0 }
0x11ff   :  { %v2077_v17 = vpop.f32.mrf.mxu0 }
0x1200   :  { %v2798_v18 = vpack.i.bf16 %v2077_v17, %v2001_v14 }
0x1201   :  { %v2748_v0 = vpop.f32.mrf.mxu0 }
0x1202   :  { %2799 = vrot.lane.b32.xlu1 %v2798_v18, %s2949_s18 }
0x1274   :  { %v2800_v19 = vpop.permute.xlu1 %2799 }
0x1275   :  { %v2802_v20 = vunpack.i.h.bf16 %v2800_v19  ;;  %v2801_v21 = vunpack.i.l.bf16 %v2800_v19 }
0x1277   :  { %v2090_v31 = vsel %vm154_vm2, %v1925_v10, %v2802_v20  ;;  %v2089_v1 = vsel %vm154_vm2, %v1849_v54, %v2801_v21 }
0x1278   :  { %v2091_v23 = vpack.c.bf16 %v2090_v31, %v2089_v1 }
0x127a   :  { %2754 = vmatmul.mubr.msk.bf16.vlgmr.msra.gmra.mxu1 %vm44_vm0, %v2091_v23 }
0x127b   :  { %2781 = vmatprep.mubr.msk.bf16.mxu1 %vm2944_vm1, %v2943_v15  ;;  %2766 = vmatpush3.bf16.msra.mxu1 %v2823_v53 }
0x127c   :  { %2767 = vmatprep.subr.bf16.mxu1 %v2943_v15 }
0x127f   :  { %2768 = vmatpush3.bf16.msra.mxu1 %v2824_v56 }
0x1280   :  { %2769 = vmatprep.subr.bf16.mxu1 %v2943_v15 }
0x1283   :  { %2770 = vmatpush3.bf16.msra.mxu1 %v2825_v4 }
0x1284   :  { %2771 = vmatprep.subr.bf16.mxu1 %v2943_v15 }
0x1287   :  { %2772 = vmatpush3.bf16.msra.mxu1 %v2826_v62 }
0x1288   :  { %2773 = vmatprep.subr.bf16.mxu1 %v2943_v15 }
0x128b   :  { %2774 = vmatpush3.bf16.msra.mxu1 %v2827_v63 }
0x128c   :  { %2775 = vmatprep.subr.bf16.mxu1 %v2943_v15 }
0x128f   :  { %2776 = vmatpush3.bf16.msra.mxu1 %v2828_v3 }
0x1290   :  { %2777 = vmatprep.subr.bf16.mxu1 %v2943_v15 }
0x1293   :  { %2778 = vmatpush3.bf16.msra.mxu1 %v2829_v5 }
0x1294   :  { %2779 = vmatprep.subr.bf16.mxu1 %v2943_v15 }
0x1297   :  { %2780 = vmatpush3.bf16.msra.mxu1 %v2830_v7 }
0x133a   :  { %v2146_v24 = vpop.f32.mrf.mxu1 }
0x133b   :  { %v3405_v27 = vadd.f32 %v2146_v24, %v3255_v22 }
0x133c   :  { %v2755_v28 = vpop.f32.mrf.mxu1 }
0x133d   :  { %v2157_v29 = vsel %vm44_vm0, %v3405_v27, 0.0 }
0x133e   :  { %2158 = vadd.xlane.f32.xlu0 %v2157_v29  ;;  %v2149_v30 = vpop.f32.mrf.mxu1 }
0x133f   :  { %v3410_v48 = vadd.f32 %v2149_v30, %v3260_v25 }
0x1340   :  { %v2756_v32 = vpop.f32.mrf.mxu1 }
0x1341   :  { %v2160_v8 = vsel %vm44_vm0, %v3410_v48, 0.0 }
0x1342   :  { %2161 = vadd.xlane.f32.xlu1 %v2160_v8 }
0x13c7   :  { %v2159_v52 = vpop.xlane.xlu0 %2158 }
0x13c8   :  { %v2163_v34 = vmul.f32 0.03125, %v2159_v52 }
0x13ca   :  { %v2165_v35 = vsub.f32 %v3405_v27, %v2163_v34 }
0x13cb   :  { %v2162_v22 = vpop.xlane.xlu1 %2161 }
0x13cc   :  { %v2164_v36 = vmul.f32 0.03125, %v2162_v22  ;;  %v2167_v55 = vmul.f32 %v2165_v35, %v2165_v35 }
0x13ce   :  { %v2166_v60 = vsub.f32 %v3410_v48, %v2164_v36  ;;  %v2169_v38 = vsel %vm44_vm0, %v2167_v55, 0.0 }
0x13cf   :  { %2170 = vadd.xlane.f32.xlu0 %v2169_v38 }
0x13d0   :  { %v2168_v2 = vmul.f32 %v2166_v60, %v2166_v60 }
0x13d2   :  { %v2172_v25 = vsel %vm44_vm0, %v2168_v2, 0.0 }
0x13d3   :  { %2173 = vadd.xlane.f32.xlu0 %v2172_v25 }
0x1458   :  { %v2171_v37 = vpop.xlane.xlu0 %2170 }
0x1459   :  { %v2175_v41 = vmul.f32 0.03125, %v2171_v37 }
0x145b   :  { %v2177_v33 = vadd.f32 1e-05, %v2175_v41 }
0x145c   :  { %v2174_v58 = vpop.xlane.xlu0 %2173 }
0x145d   :  { %2911 = vrsqrt.f32 %v2177_v33  ;;  %v2176_v39 = vmul.f32 0.03125, %v2174_v58 }
0x145f   :  { %v2178_v42 = vadd.f32 1e-05, %v2176_v39 }
0x1461   :  { %2913 = vrsqrt.f32 %v2178_v42 }
0x146a   :  { %v2912_v43 = vpop.eup %2911 }
0x146b   :  { %v2181_v44 = vmul.f32 %v2912_v43, %v2165_v35 }
0x146d   :  { %v2189_v49 = vmul.f32 %v2516_v46, %v2181_v44 }
0x146e   :  { %v2914_v45 = vpop.eup %2913 }
0x146f   :  { %v2182_v47 = vmul.f32 %v2914_v45, %v2166_v60 }
0x1471   :  { %v2190_v50 = vmul.f32 %v2516_v46, %v2182_v47 }
0x1473   :  { %v2191_v51 = vpack.c.bf16 %v2190_v50, %v2189_v49  ;;  %v2548_v49 = vld [vmem:[%s3485_s9] ss:$0 sm:$0xff] }
0x1475   :  { %2762 = vmatmul.mubr.msk.bf16.vlgmr.msra.gmra.mxu0 %vm44_vm0, %v2191_v51 }
0x1535   :  { %v2246_v57 = vpop.f32.mrf.mxu0 }
0x1536   :  { %2253 = vrot.lane.b32.xlu0 %v2246_v57, %s2948_s15 }
0x1537   :  { %v2763_v59 = vpop.f32.mrf.mxu0 }
0x1539   :  { %v2249_v6 = vpop.f32.mrf.mxu0 }
0x153a   :  { %2255 = vrot.lane.b32.xlu1 %v2249_v6, %s2948_s15 }
0x153b   :  { %v2764_v61 = vpop.f32.mrf.mxu0 }
0x15a8   :  { %v2254_v9 = vpop.permute.xlu0 %2253 }
0x15a9   :  { %v2257_v54 = vmul.f32 %v2254_v9, %v2254_v9 }
0x15ab   :  { %v2259_v26 = vmul.f32 %v2257_v54, %v2254_v9 }
0x15ac   :  { %v2256_v10 = vpop.permute.xlu1 %2255 }
0x15ad   :  { %v2261_v11 = vmul.f32 0.044715, %v2259_v26  ;;  %v2258_v13 = vmul.f32 %v2256_v10, %v2256_v10 }
0x15af   :  { %v2263_v14 = vadd.f32 %v2261_v11, %v2254_v9  ;;  %v2260_v16 = vmul.f32 %v2258_v13, %v2256_v10 }
0x15b1   :  { %v2265_v17 = vmul.f32 0.7978846, %v2263_v14  ;;  %v2262_v18 = vmul.f32 0.044715, %v2260_v16 }
0x15b3   :  { %2915 = vtanh.f32 %v2265_v17  ;;  %v2264_v0 = vadd.f32 %v2262_v18, %v2256_v10 }
0x15b5   :  { %v2266_v19 = vmul.f32 0.7978846, %v2264_v0 }
0x15b7   :  { %2917 = vtanh.f32 %v2266_v19 }
0x15c0   :  { %v2916_v15 = vpop.eup %2915 }
0x15c1   :  { %v2269_v20 = vadd.f32 1.0, %v2916_v15 }
0x15c3   :  { %v2271_v21 = vmul.f32 0.5, %v2269_v20 }
0x15c4   :  { %v2918_v31 = vpop.eup %2917 }
0x15c5   :  { %v2270_v1 = vadd.f32 1.0, %v2918_v31  ;;  %v2273_v23 = vmul.f32 %v2271_v21, %v2254_v9 }
0x15c7   :  { %v2272_v24 = vmul.f32 0.5, %v2270_v1  ;;  %v2275_v29 = vmul.f32 %v2273_v23, %v2246_v57 }
0x15c9   :  { %v2274_v28 = vmul.f32 %v2272_v24, %v2256_v10 }
0x15cb   :  { %v2276_v30 = vmul.f32 %v2274_v28, %v2249_v6 }
0x15cd   :  { %v2277_v32 = vpack.c.bf16 %v2276_v30, %v2275_v29 }
0x15cf   :  { %2782 = vmatmul.mubr.bf16.vlgmr.msra.gmra.mxu1 %v2277_v32 }
0x168f   :  { %v2377_v8 = vpop.f32.mrf.mxu1 }
0x1690   :  { %v2384_v36 = vadd.f32 %v2377_v8, %v3405_v27 }
0x1691   :  { %v2783_v52 = vpop.f32.mrf.mxu1 }
0x1693   :  { %v2380_v34 = vpop.f32.mrf.mxu1 }
0x1694   :  { %v2385_v35 = vadd.f32 %v2380_v34, %v3410_v48 }
0x1695   :  { %v2784_v22 = vpop.f32.mrf.mxu1 }
0x1696   :  { %v2389_v55 = vrot.slane %v2385_v35, 7 }
0x1698   :  { %v2391_v60 = vsel %vm2390_vm4, %v2389_v55, %v2384_v36 }
0x1699   :  { %v2394_v38 = vsel %vm2393_vm5, %v2391_v60, 0.0 }
0x169a   :  { %2395 = vadd.xlane.f32.xlu1 %v2394_v38 }
0x1723   :  { %v2396_v2 = vpop.xlane.xlu1 %2395 }
0x1724   :  { %v2397_v25 = vmul.f32 0.03125, %v2396_v2 }
0x1726   :  { %v2399_v40 = vrot.slane %v2397_v25, 1  ;;  %v2402_v12 = vsub.f32 %v2384_v36, %v2397_v25 }
0x1728   :  { %v2403_v37 = vsub.f32 %v2385_v35, %v2399_v40  ;;  %v2404_v33 = vmul.f32 %v2402_v12, %v2402_v12 }
0x172a   :  { %v2405_v41 = vmul.f32 %v2403_v37, %v2403_v37 }
0x172c   :  { %v2408_v58 = vrot.slane %v2405_v41, 7 }
0x172e   :  { %v2409_v48 = vsel %vm2390_vm4, %v2408_v58, %v2404_v33 }
0x172f   :  { %v2411_v39 = vsel %vm2393_vm5, %v2409_v48, 0.0 }
0x1730   :  { %2412 = vadd.xlane.f32.xlu0 %v2411_v39 }
0x17b9   :  { %v2413_v27 = vpop.xlane.xlu0 %2412 }
0x17ba   :  { %v2414_v42 = vmul.f32 0.03125, %v2413_v27 }
0x17bc   :  { %v2415_v43 = vadd.f32 1e-05, %v2414_v42 }
0x17be   :  { %2919 = vrsqrt.f32 %v2415_v43 }
0x17cb   :  { %v2920_v44 = vpop.eup %2919 }
0x17cc   :  { %v2418_v45 = vrot.slane %v2920_v44, 1  ;;  %v2421_v46 = vmul.f32 %v2920_v44, %v2402_v12 }
0x17ce   :  { %v2422_v47 = vmul.f32 %v2418_v45, %v2403_v37  ;;  %v2429_v51 = vmul.f32 %v2548_v49, %v2421_v46 }
0x17d0   :  { %v2430_v50 = vmul.f32 %v2548_v49, %v2422_v47 }
0x17d2   :  { %v2433_v53 = vrot.slane %v2430_v50, 7 }
0x17d4   :  { %v2434_v56 = vsel %vm2390_vm4, %v2433_v53, %v2429_v51 }
0x17d5   :  { %2436 = vst.msk [vmem:[#allocation2] sm:$0x3] %vm2393_vm5, %v2434_v56 }
0x17d6   :  { %2932 = shalt.err (!%p2929_p4)
}
0x17d7   :  { %2446 = dma.vmem_to_hbm [thread:$0]  %s2444_s4, 32, %s3486_s10, [#allocation3]  }
0x17d8   :  { %2941 = dma.done.wait [#allocation3], 32  }
0x17d9   :  { %2942 = vsyncadd [#allocation3], 4294967264 }
0x17da   :  { %2450 = vsyncpa [#allocation3], 1 }

</bundles_post_ra>
